<compile_context>
chip_gen: v5e
topology: v5e:2x2
jax: 0.10.0
libtpu: 0.0.40
codegen_flags: <defaults>
</compile_context>

<pallas_src>
import functools

import jax
import jax.numpy as jnp
from jax.experimental import pallas as pl
from jax.experimental.pallas import tpu as pltpu

_LANE = 128


def _round_up(n, m):
    return ((n + m - 1) // m) * m


def _leaky_relu(x, slope=0.01):
    return jnp.where(x > 0, x, slope * x)


def _sae_kernel(x_ref, *refs, acts):
    """refs = (w0, b0, w1, b1, ..., out_ref); `acts` is a static bool tuple."""
    out_ref = refs[-1]
    wb = refs[:-1]
    h = x_ref[...]                                    # (bt, n_features) f32
    for li, act in enumerate(acts):
        w = wb[2 * li][...]
        b = wb[2 * li + 1][...]
        h = jnp.dot(h, w, preferred_element_type=jnp.float32) + b
        if act:
            h = _leaky_relu(h)
    out_ref[...] = h                                  # lane-dense (128-mult) store


def prepare_params(params, *, fold_latent=True):
    """Run ONCE per model. Pads widths to 128 lanes and (optionally) folds the
    activation-free en4/de1 pair into a single linear.

    params: list of 8 (W (in, out), b (1, out)) pairs.
    Returns (flat_padded_params, acts) where acts is a static activation mask.
    """
    layers = [(w.astype(jnp.float32), b.astype(jnp.float32)) for (w, b) in params]

    if fold_latent:
        # No activation between en4 and de1 -> fold: h @ (w4 @ w5) + (b4 @ w5 + b5)
        w4, b4 = layers[3]
        w5, b5 = layers[4]
        layers = layers[:3] + [(w4 @ w5, b4 @ w5 + b5)] + layers[5:]
        acts = (True,) * (len(layers) - 1) + (False,)   # leaky after all but last
    else:
        acts = (True, True, True, False, True, True, True, False)

    flat = []
    for li, (w, b) in enumerate(layers):
        fi, fo = w.shape
        # First-layer input dim stays un-padded (x is passed with its true lane
        # width); all other widths are zero-padded to 128-lane multiples.
        fip = fi if li == 0 else _round_up(fi, _LANE)
        fop = _round_up(fo, _LANE)
        wp = jnp.zeros((fip, fop), jnp.float32).at[:fi, :fo].set(w)
        bp = jnp.zeros((1, fop), jnp.float32).at[:, :fo].set(b)
        flat += [wp, bp]
    return tuple(flat), acts


@functools.partial(jax.jit, static_argnames=("acts", "batch_tile"))
def _forward_impl(x, flat_params, acts, batch_tile):
    B = x.shape[0]
    n_features = flat_params[0].shape[0]   # first-layer in-dim (un-padded)
    Fo = flat_params[-1].shape[1]          # padded output width (128 mult)

    # Batch tile: one grid step for small batches, `batch_tile` rows otherwise.
    bt = min(_round_up(B, 8), _round_up(batch_tile, 8))
    Bp = _round_up(B, bt)

    x = x.astype(jnp.float32)
    if Bp != B:
        x = jnp.pad(x, ((0, Bp - B), (0, 0)))

    # Input block keeps the true (small) lane width; weights/biases are
    # grid-invariant full-array blocks; output is lane-dense (padded width).
    in_specs = [pl.BlockSpec((bt, n_features), lambda i: (i, 0))]
    for p in flat_params:
        in_specs.append(pl.BlockSpec(p.shape, lambda i: (0, 0)))
    out_spec = pl.BlockSpec((bt, Fo), lambda i: (i, 0))

    out = pl.pallas_call(
        functools.partial(_sae_kernel, acts=acts),
        out_shape=jax.ShapeDtypeStruct((Bp, Fo), jnp.float32),
        grid_spec=pltpu.PrefetchScalarGridSpec(
            num_scalar_prefetch=0,
            grid=(Bp // bt,),
            in_specs=in_specs,
            out_specs=out_spec,
        ),
        compiler_params=pltpu.CompilerParams(
            dimension_semantics=("parallel",)),
    )(x, *flat_params)

    return out[:B, :n_features]


def george_sae_forward(x, prepared, *, batch_tile=1024):
    """x: (B, n_features). prepared = prepare_params(params)."""
    flat_params, acts = prepared
    return _forward_impl(x, flat_params, acts, batch_tile)


def init_params(key, n_features, z_dim):
    """Deterministic init matching george_SAE layer shapes.
    PyTorch Linear weight is (out, in); we store the transpose (in, out)."""
    dims = [n_features, 200, 100, 50, z_dim, 50, 100, 200, n_features]
    params = []
    for li in range(8):
        fan_in, fan_out = dims[li], dims[li + 1]
        key, kw, kb = jax.random.split(key, 3)
        bound = 1.0 / jnp.sqrt(jnp.float32(fan_in))
        w = jax.random.uniform(kw, (fan_in, fan_out), jnp.float32, -bound, bound)
        b = jax.random.uniform(kb, (1, fan_out), jnp.float32, -bound, bound)
        params.append((w, b))
    return params


def _reference(x, params):
    h = x
    for li, (w, b) in enumerate(params):
        h = h @ w + b
        if li not in (3, 7):   # no activation after en4 (latent) / de4 (output)
            h = _leaky_relu(h)
    return h


if __name__ == "__main__":
    n_features = 32
    z_dim = 8
    batch = 256            # small shapes; batch_tile=128 -> 2 pipelined grid steps

    key = jax.random.PRNGKey(0)
    key, kx = jax.random.split(key)
    x = jax.random.normal(kx, (batch, n_features), jnp.float32)

    params = init_params(key, n_features, z_dim)
    prepared = prepare_params(params, fold_latent=True)   # pad/fold ONCE

    out = george_sae_forward(x, prepared, batch_tile=128)
    out = jax.block_until_ready(out)

    ref = _reference(x, params)
    assert out.shape == (batch, n_features)
    assert jnp.allclose(out, ref, atol=5e-4, rtol=5e-4), "mismatch vs reference"

    print("KERNEL_OK")
</pallas_src>

<mosaic_0001>
module attributes {stable_mosaic.version = 11 : i64} {
  func.func @_sae_kernel(%arg0: i32, %arg1: memref<128x32xf32, #tpu.memory_space<vmem>>, %arg2: memref<32x256xf32, #tpu.memory_space<vmem>>, %arg3: memref<1x256xf32, #tpu.memory_space<vmem>>, %arg4: memref<256x128xf32, #tpu.memory_space<vmem>>, %arg5: memref<1x128xf32, #tpu.memory_space<vmem>>, %arg6: memref<128x128xf32, #tpu.memory_space<vmem>>, %arg7: memref<1x128xf32, #tpu.memory_space<vmem>>, %arg8: memref<128x128xf32, #tpu.memory_space<vmem>>, %arg9: memref<1x128xf32, #tpu.memory_space<vmem>>, %arg10: memref<128x128xf32, #tpu.memory_space<vmem>>, %arg11: memref<1x128xf32, #tpu.memory_space<vmem>>, %arg12: memref<128x256xf32, #tpu.memory_space<vmem>>, %arg13: memref<1x256xf32, #tpu.memory_space<vmem>>, %arg14: memref<256x128xf32, #tpu.memory_space<vmem>>, %arg15: memref<1x128xf32, #tpu.memory_space<vmem>>, %arg16: memref<128x128xf32, #tpu.memory_space<vmem>>) attributes {dimension_semantics = [#tpu.dimension_semantics<parallel>], iteration_bounds = array<i64: 2>, scalar_prefetch = 0 : i64, scratch_operands = 0 : i64, tpu.core_type = #tpu.core_type<tc>, window_params = [{transform_indices = @transform_0, window_bounds = array<i64: 128, 32>}, {pipeline_mode = #tpu.pipeline_mode<synchronous>, transform_indices = @transform_1, window_bounds = array<i64: 32, 256>}, {pipeline_mode = #tpu.pipeline_mode<synchronous>, transform_indices = @transform_2, window_bounds = array<i64: 1, 256>}, {pipeline_mode = #tpu.pipeline_mode<synchronous>, transform_indices = @transform_3, window_bounds = array<i64: 256, 128>}, {pipeline_mode = #tpu.pipeline_mode<synchronous>, transform_indices = @transform_4, window_bounds = array<i64: 1, 128>}, {pipeline_mode = #tpu.pipeline_mode<synchronous>, transform_indices = @transform_5, window_bounds = array<i64: 128, 128>}, {pipeline_mode = #tpu.pipeline_mode<synchronous>, transform_indices = @transform_6, window_bounds = array<i64: 1, 128>}, {pipeline_mode = #tpu.pipeline_mode<synchronous>, transform_indices = @transform_7, window_bounds = array<i64: 128, 128>}, {pipeline_mode = #tpu.pipeline_mode<synchronous>, transform_indices = @transform_8, window_bounds = array<i64: 1, 128>}, {pipeline_mode = #tpu.pipeline_mode<synchronous>, transform_indices = @transform_9, window_bounds = array<i64: 128, 128>}, {pipeline_mode = #tpu.pipeline_mode<synchronous>, transform_indices = @transform_10, window_bounds = array<i64: 1, 128>}, {pipeline_mode = #tpu.pipeline_mode<synchronous>, transform_indices = @transform_11, window_bounds = array<i64: 128, 256>}, {pipeline_mode = #tpu.pipeline_mode<synchronous>, transform_indices = @transform_12, window_bounds = array<i64: 1, 256>}, {pipeline_mode = #tpu.pipeline_mode<synchronous>, transform_indices = @transform_13, window_bounds = array<i64: 256, 128>}, {pipeline_mode = #tpu.pipeline_mode<synchronous>, transform_indices = @transform_14, window_bounds = array<i64: 1, 128>}, {transform_indices = @transform_15, window_bounds = array<i64: 128, 128>}]} {
    %c0 = arith.constant 0 : index
    %c0_0 = arith.constant 0 : index
    %0 = vector.load %arg1[%c0, %c0_0] : memref<128x32xf32, #tpu.memory_space<vmem>>, vector<128x32xf32>
    %c0_1 = arith.constant 0 : index
    %c0_2 = arith.constant 0 : index
    %1 = vector.load %arg2[%c0_1, %c0_2] : memref<32x256xf32, #tpu.memory_space<vmem>>, vector<32x256xf32>
    %c0_3 = arith.constant 0 : index
    %c0_4 = arith.constant 0 : index
    %2 = vector.load %arg3[%c0_3, %c0_4] : memref<1x256xf32, #tpu.memory_space<vmem>>, vector<1x256xf32>
    %cst = arith.constant dense<0.000000e+00> : vector<128x256xf32>
    %3 = tpu.matmul %0, %1, %cst {dimension_numbers = #tpu.dot_dimension_numbers<[1], [0], [0], [1], [0, 0, 1, 1], [], []>} : vector<128x32xf32>, vector<32x256xf32>, vector<128x256xf32> -> vector<128x256xf32>
    %4 = vector.broadcast %2 : vector<1x256xf32> to vector<128x256xf32>
    %5 = arith.addf %3, %4 : vector<128x256xf32>
    %cst_5 = arith.constant 0.000000e+00 : f32
    %6 = vector.broadcast %cst_5 : f32 to vector<128x256xf32>
    %7 = arith.cmpf ogt, %5, %6 : vector<128x256xf32>
    %cst_6 = arith.constant 0.00999999977 : f32
    %8 = vector.broadcast %cst_6 : f32 to vector<128x256xf32>
    %9 = arith.mulf %8, %5 : vector<128x256xf32>
    %10 = arith.select %7, %5, %9 : vector<128x256xi1>, vector<128x256xf32>
    %c0_7 = arith.constant 0 : index
    %c0_8 = arith.constant 0 : index
    %11 = vector.load %arg4[%c0_7, %c0_8] : memref<256x128xf32, #tpu.memory_space<vmem>>, vector<256x128xf32>
    %c0_9 = arith.constant 0 : index
    %c0_10 = arith.constant 0 : index
    %12 = vector.load %arg5[%c0_9, %c0_10] : memref<1x128xf32, #tpu.memory_space<vmem>>, vector<1x128xf32>
    %cst_11 = arith.constant dense<0.000000e+00> : vector<128x128xf32>
    %13 = tpu.matmul %10, %11, %cst_11 {dimension_numbers = #tpu.dot_dimension_numbers<[1], [0], [0], [1], [0, 0, 1, 1], [], []>} : vector<128x256xf32>, vector<256x128xf32>, vector<128x128xf32> -> vector<128x128xf32>
    %14 = vector.broadcast %12 : vector<1x128xf32> to vector<128x128xf32>
    %15 = arith.addf %13, %14 : vector<128x128xf32>
    %cst_12 = arith.constant 0.000000e+00 : f32
    %16 = vector.broadcast %cst_12 : f32 to vector<128x128xf32>
    %17 = arith.cmpf ogt, %15, %16 : vector<128x128xf32>
    %cst_13 = arith.constant 0.00999999977 : f32
    %18 = vector.broadcast %cst_13 : f32 to vector<128x128xf32>
    %19 = arith.mulf %18, %15 : vector<128x128xf32>
    %20 = arith.select %17, %15, %19 : vector<128x128xi1>, vector<128x128xf32>
    %c0_14 = arith.constant 0 : index
    %c0_15 = arith.constant 0 : index
    %21 = vector.load %arg6[%c0_14, %c0_15] : memref<128x128xf32, #tpu.memory_space<vmem>>, vector<128x128xf32>
    %c0_16 = arith.constant 0 : index
    %c0_17 = arith.constant 0 : index
    %22 = vector.load %arg7[%c0_16, %c0_17] : memref<1x128xf32, #tpu.memory_space<vmem>>, vector<1x128xf32>
    %cst_18 = arith.constant dense<0.000000e+00> : vector<128x128xf32>
    %23 = tpu.matmul %20, %21, %cst_18 {dimension_numbers = #tpu.dot_dimension_numbers<[1], [0], [0], [1], [0, 0, 1, 1], [], []>} : vector<128x128xf32>, vector<128x128xf32>, vector<128x128xf32> -> vector<128x128xf32>
    %24 = vector.broadcast %22 : vector<1x128xf32> to vector<128x128xf32>
    %25 = arith.addf %23, %24 : vector<128x128xf32>
    %cst_19 = arith.constant 0.000000e+00 : f32
    %26 = vector.broadcast %cst_19 : f32 to vector<128x128xf32>
    %27 = arith.cmpf ogt, %25, %26 : vector<128x128xf32>
    %cst_20 = arith.constant 0.00999999977 : f32
    %28 = vector.broadcast %cst_20 : f32 to vector<128x128xf32>
    %29 = arith.mulf %28, %25 : vector<128x128xf32>
    %30 = arith.select %27, %25, %29 : vector<128x128xi1>, vector<128x128xf32>
    %c0_21 = arith.constant 0 : index
    %c0_22 = arith.constant 0 : index
    %31 = vector.load %arg8[%c0_21, %c0_22] : memref<128x128xf32, #tpu.memory_space<vmem>>, vector<128x128xf32>
    %c0_23 = arith.constant 0 : index
    %c0_24 = arith.constant 0 : index
    %32 = vector.load %arg9[%c0_23, %c0_24] : memref<1x128xf32, #tpu.memory_space<vmem>>, vector<1x128xf32>
    %cst_25 = arith.constant dense<0.000000e+00> : vector<128x128xf32>
    %33 = tpu.matmul %30, %31, %cst_25 {dimension_numbers = #tpu.dot_dimension_numbers<[1], [0], [0], [1], [0, 0, 1, 1], [], []>} : vector<128x128xf32>, vector<128x128xf32>, vector<128x128xf32> -> vector<128x128xf32>
    %34 = vector.broadcast %32 : vector<1x128xf32> to vector<128x128xf32>
    %35 = arith.addf %33, %34 : vector<128x128xf32>
    %cst_26 = arith.constant 0.000000e+00 : f32
    %36 = vector.broadcast %cst_26 : f32 to vector<128x128xf32>
    %37 = arith.cmpf ogt, %35, %36 : vector<128x128xf32>
    %cst_27 = arith.constant 0.00999999977 : f32
    %38 = vector.broadcast %cst_27 : f32 to vector<128x128xf32>
    %39 = arith.mulf %38, %35 : vector<128x128xf32>
    %40 = arith.select %37, %35, %39 : vector<128x128xi1>, vector<128x128xf32>
    %c0_28 = arith.constant 0 : index
    %c0_29 = arith.constant 0 : index
    %41 = vector.load %arg10[%c0_28, %c0_29] : memref<128x128xf32, #tpu.memory_space<vmem>>, vector<128x128xf32>
    %c0_30 = arith.constant 0 : index
    %c0_31 = arith.constant 0 : index
    %42 = vector.load %arg11[%c0_30, %c0_31] : memref<1x128xf32, #tpu.memory_space<vmem>>, vector<1x128xf32>
    %cst_32 = arith.constant dense<0.000000e+00> : vector<128x128xf32>
    %43 = tpu.matmul %40, %41, %cst_32 {dimension_numbers = #tpu.dot_dimension_numbers<[1], [0], [0], [1], [0, 0, 1, 1], [], []>} : vector<128x128xf32>, vector<128x128xf32>, vector<128x128xf32> -> vector<128x128xf32>
    %44 = vector.broadcast %42 : vector<1x128xf32> to vector<128x128xf32>
    %45 = arith.addf %43, %44 : vector<128x128xf32>
    %cst_33 = arith.constant 0.000000e+00 : f32
    %46 = vector.broadcast %cst_33 : f32 to vector<128x128xf32>
    %47 = arith.cmpf ogt, %45, %46 : vector<128x128xf32>
    %cst_34 = arith.constant 0.00999999977 : f32
    %48 = vector.broadcast %cst_34 : f32 to vector<128x128xf32>
    %49 = arith.mulf %48, %45 : vector<128x128xf32>
    %50 = arith.select %47, %45, %49 : vector<128x128xi1>, vector<128x128xf32>
    %c0_35 = arith.constant 0 : index
    %c0_36 = arith.constant 0 : index
    %51 = vector.load %arg12[%c0_35, %c0_36] : memref<128x256xf32, #tpu.memory_space<vmem>>, vector<128x256xf32>
    %c0_37 = arith.constant 0 : index
    %c0_38 = arith.constant 0 : index
    %52 = vector.load %arg13[%c0_37, %c0_38] : memref<1x256xf32, #tpu.memory_space<vmem>>, vector<1x256xf32>
    %cst_39 = arith.constant dense<0.000000e+00> : vector<128x256xf32>
    %53 = tpu.matmul %50, %51, %cst_39 {dimension_numbers = #tpu.dot_dimension_numbers<[1], [0], [0], [1], [0, 0, 1, 1], [], []>} : vector<128x128xf32>, vector<128x256xf32>, vector<128x256xf32> -> vector<128x256xf32>
    %54 = vector.broadcast %52 : vector<1x256xf32> to vector<128x256xf32>
    %55 = arith.addf %53, %54 : vector<128x256xf32>
    %cst_40 = arith.constant 0.000000e+00 : f32
    %56 = vector.broadcast %cst_40 : f32 to vector<128x256xf32>
    %57 = arith.cmpf ogt, %55, %56 : vector<128x256xf32>
    %cst_41 = arith.constant 0.00999999977 : f32
    %58 = vector.broadcast %cst_41 : f32 to vector<128x256xf32>
    %59 = arith.mulf %58, %55 : vector<128x256xf32>
    %60 = arith.select %57, %55, %59 : vector<128x256xi1>, vector<128x256xf32>
    %c0_42 = arith.constant 0 : index
    %c0_43 = arith.constant 0 : index
    %61 = vector.load %arg14[%c0_42, %c0_43] : memref<256x128xf32, #tpu.memory_space<vmem>>, vector<256x128xf32>
    %c0_44 = arith.constant 0 : index
    %c0_45 = arith.constant 0 : index
    %62 = vector.load %arg15[%c0_44, %c0_45] : memref<1x128xf32, #tpu.memory_space<vmem>>, vector<1x128xf32>
    %cst_46 = arith.constant dense<0.000000e+00> : vector<128x128xf32>
    %63 = tpu.matmul %60, %61, %cst_46 {dimension_numbers = #tpu.dot_dimension_numbers<[1], [0], [0], [1], [0, 0, 1, 1], [], []>} : vector<128x256xf32>, vector<256x128xf32>, vector<128x128xf32> -> vector<128x128xf32>
    %64 = vector.broadcast %62 : vector<1x128xf32> to vector<128x128xf32>
    %65 = arith.addf %63, %64 : vector<128x128xf32>
    %c0_47 = arith.constant 0 : index
    %c0_48 = arith.constant 0 : index
    %66 = vector.load %arg16[%c0_47, %c0_48] : memref<128x128xf32, #tpu.memory_space<vmem>>, vector<128x128xf32>
    tpu.vector_store %arg16[%c0_47, %c0_48], %65 {strides = array<i32>} : memref<128x128xf32, #tpu.memory_space<vmem>>, vector<128x128xf32>,
    return
  }
  func.func @transform_0(%arg0: i32) -> (i32, i32) {
    %c0_i32 = arith.constant 0 : i32
    %c0_i32_0 = arith.constant 0 : i32
    return %arg0, %c0_i32 : i32, i32
  }
  func.func @transform_1(%arg0: i32) -> (i32, i32) {
    %c0_i32 = arith.constant 0 : i32
    %c0_i32_0 = arith.constant 0 : i32
    %c0_i32_1 = arith.constant 0 : i32
    return %c0_i32, %c0_i32_0 : i32, i32
  }
  func.func @transform_2(%arg0: i32) -> (i32, i32) {
    %c0_i32 = arith.constant 0 : i32
    %c0_i32_0 = arith.constant 0 : i32
    %c0_i32_1 = arith.constant 0 : i32
    return %c0_i32, %c0_i32_0 : i32, i32
  }
  func.func @transform_3(%arg0: i32) -> (i32, i32) {
    %c0_i32 = arith.constant 0 : i32
    %c0_i32_0 = arith.constant 0 : i32
    %c0_i32_1 = arith.constant 0 : i32
    return %c0_i32, %c0_i32_0 : i32, i32
  }
  func.func @transform_4(%arg0: i32) -> (i32, i32) {
    %c0_i32 = arith.constant 0 : i32
    %c0_i32_0 = arith.constant 0 : i32
    %c0_i32_1 = arith.constant 0 : i32
    return %c0_i32, %c0_i32_0 : i32, i32
  }
  func.func @transform_5(%arg0: i32) -> (i32, i32) {
    %c0_i32 = arith.constant 0 : i32
    %c0_i32_0 = arith.constant 0 : i32
    %c0_i32_1 = arith.constant 0 : i32
    return %c0_i32, %c0_i32_0 : i32, i32
  }
  func.func @transform_6(%arg0: i32) -> (i32, i32) {
    %c0_i32 = arith.constant 0 : i32
    %c0_i32_0 = arith.constant 0 : i32
    %c0_i32_1 = arith.constant 0 : i32
    return %c0_i32, %c0_i32_0 : i32, i32
  }
  func.func @transform_7(%arg0: i32) -> (i32, i32) {
    %c0_i32 = arith.constant 0 : i32
    %c0_i32_0 = arith.constant 0 : i32
    %c0_i32_1 = arith.constant 0 : i32
    return %c0_i32, %c0_i32_0 : i32, i32
  }
  func.func @transform_8(%arg0: i32) -> (i32, i32) {
    %c0_i32 = arith.constant 0 : i32
    %c0_i32_0 = arith.constant 0 : i32
    %c0_i32_1 = arith.constant 0 : i32
    return %c0_i32, %c0_i32_0 : i32, i32
  }
  func.func @transform_9(%arg0: i32) -> (i32, i32) {
    %c0_i32 = arith.constant 0 : i32
    %c0_i32_0 = arith.constant 0 : i32
    %c0_i32_1 = arith.constant 0 : i32
    return %c0_i32, %c0_i32_0 : i32, i32
  }
  func.func @transform_10(%arg0: i32) -> (i32, i32) {
    %c0_i32 = arith.constant 0 : i32
    %c0_i32_0 = arith.constant 0 : i32
    %c0_i32_1 = arith.constant 0 : i32
    return %c0_i32, %c0_i32_0 : i32, i32
  }
  func.func @transform_11(%arg0: i32) -> (i32, i32) {
    %c0_i32 = arith.constant 0 : i32
    %c0_i32_0 = arith.constant 0 : i32
    %c0_i32_1 = arith.constant 0 : i32
    return %c0_i32, %c0_i32_0 : i32, i32
  }
  func.func @transform_12(%arg0: i32) -> (i32, i32) {
    %c0_i32 = arith.constant 0 : i32
    %c0_i32_0 = arith.constant 0 : i32
    %c0_i32_1 = arith.constant 0 : i32
    return %c0_i32, %c0_i32_0 : i32, i32
  }
  func.func @transform_13(%arg0: i32) -> (i32, i32) {
    %c0_i32 = arith.constant 0 : i32
    %c0_i32_0 = arith.constant 0 : i32
    %c0_i32_1 = arith.constant 0 : i32
    return %c0_i32, %c0_i32_0 : i32, i32
  }
  func.func @transform_14(%arg0: i32) -> (i32, i32) {
    %c0_i32 = arith.constant 0 : i32
    %c0_i32_0 = arith.constant 0 : i32
    %c0_i32_1 = arith.constant 0 : i32
    return %c0_i32, %c0_i32_0 : i32, i32
  }
  func.func @transform_15(%arg0: i32) -> (i32, i32) {
    %c0_i32 = arith.constant 0 : i32
    %c0_i32_0 = arith.constant 0 : i32
    return %arg0, %c0_i32 : i32, i32
  }
}

</mosaic_0001>

<bundles_post_ra>
// kernel: _forward_impl.1
= control target key start
LH: loop header
LB: loop body
LE: loop exit
PB: predicated region body
PF: predicated region fallthrough
CT: control target
= control target key end

     0   :  { %s3146_s0 = inlined_call_operand.vmem [shape: f32[256,32], index: 0, kind: input, shape index: {}]   ;;  %s3147_s1 = inlined_call_operand.vmem [shape: f32[32,256], index: 1, kind: input, shape index: {}]   ;;  %s3148_s2 = inlined_call_operand.vmem [shape: f32[1,256], index: 2, kind: input, shape index: {}]   ;;  %s3149_s3 = inlined_call_operand.vmem [shape: f32[256,128], index: 3, kind: input, shape index: {}]   ;;  %s3150_s4 = inlined_call_operand.vmem [shape: f32[1,128], index: 4, kind: input, shape index: {}]   ;;  %s3151_s5 = inlined_call_operand.hbm [shape: f32[128,128], index: 5, kind: input, shape index: {}]   ;;  %s3152_s6 = inlined_call_operand.hbm [shape: f32[1,128], index: 6, kind: input, shape index: {}]   ;;  %s3153_s7 = inlined_call_operand.hbm [shape: f32[128,128], index: 7, kind: input, shape index: {}]   ;;  %s3154_s8 = inlined_call_operand.vmem [shape: f32[1,128], index: 8, kind: input, shape index: {}]   ;;  %s3155_s9 = inlined_call_operand.hbm [shape: f32[128,128], index: 9, kind: input, shape index: {}]   ;;  %s3156_s10 = inlined_call_operand.vmem [shape: f32[1,128], index: 10, kind: input, shape index: {}]   ;;  %s3157_s11 = inlined_call_operand.hbm [shape: f32[128,256], index: 11, kind: input, shape index: {}]   ;;  %s3158_s12 = inlined_call_operand.vmem [shape: f32[1,256], index: 12, kind: input, shape index: {}]   ;;  %s3159_s13 = inlined_call_operand.hbm [shape: f32[256,128], index: 13, kind: input, shape index: {}]   ;;  %s3160_s14 = inlined_call_operand.vmem [shape: f32[1,128], index: 14, kind: input, shape index: {}]   ;;  %s3161_s15 = inlined_call_operand.vmem [shape: f32[256,128], index: 15, kind: output, shape index: {}]  }
   0x1   :  { %3163 = sst [smem:[#allocation16_spill]] %s3151_s5 }
   0x2   :  { %3164 = sst [smem:[#allocation17_spill]] %s3152_s6 }
   0x3   :  { %3165 = sst [smem:[#allocation18_spill]] %s3155_s9 }
   0x4   :  { %20 = vsyncpa [#allocation3], 0 }
   0x5   :  { %21 = vsyncpa [#allocation5], 0 }
   0x6   :  { %22 = vsyncpa [#allocation8], 0 }
   0x7   :  { %23 = vsyncpa [#allocation11], 0  ;;  %s2551_s18 = smov 0  }
   0x8 LB: > { %s3166_s6 = sld [smem:[#allocation17_spill]]  ;;  %s3162_s22 = sadd.s32 4294967295, %s2459_s18   ;;  %s2459_s18 = sphi %s2551_s18, %s29_s18  }
   0x9   : > { %p2078_p0 = scmp.ge.s32.totalorder %s2459_s18, 1  ;;  %p380_p1 = scmp.lt.s32.totalorder %s2459_s18, 3 }
   0xa   : > { %p2564_p2 = scmp.eq.s32.totalorder %s3162_s22, 0  ;;  %s2461_s25 = smov [#allocation4]  }
   0xb   : > { %p2568_p3 = pnand %p2078_p0, %p380_p1  ;;  %s420_s26 = sshll.u32 %s2461_s25, 4  ;;  %s421_s26 = int_to_ptr.vmem [resolvable:$true] %s420_s26 }
   0xc   : > { %s3169_s9 = sld [smem:[#allocation18_spill]]  ;;  %s2462_s16 = smov [#allocation7]  }
   0xd   : > { %p2203_p4 = pneg %p2568_p3  ;;  %s448_s17 = sshll.u32 %s2462_s16, 4  ;;  %s449_s17 = int_to_ptr.vmem [resolvable:$true] %s448_s17 }
   0xe   : > { %s418_s21 = sshll.u32 %s3166_s6, 4  ;;  %s3171_s5 = sld [smem:[#allocation16_spill]]  ;;  %s419_s21 = int_to_ptr.hbm [resolvable:$true] %s418_s21 }
   0xf   : > { %p2579_p5 = pnand %p2564_p2, %p2203_p4  ;;  %s2463_s27 = smov 128  }
  0x10   : > { %s2464_s28 = smov 8   ;;  %s2465_s22 = smov [#allocation2]  }
  0x11   : > { %2209 = dma.hbm_to_vmem [thread:$0]  (!%p2579_p5), %s419_s21, 16, %s421_s26, [#allocation5]  }
  0x12   : > { %s446_s29 = sshll.u32 %s3169_s9, 4  ;;  %s405_s6 = sshll.u32 %s2465_s22, 4  ;;  %s447_s29 = int_to_ptr.hbm [resolvable:$true] %s446_s29  ;;  %s406_s6 = int_to_ptr.vmem [resolvable:$true] %s405_s6 }
  0x13   : > { %2215 = dma.hbm_to_vmem [thread:$0]  (!%p2579_p5), %s447_s29, 2048, %s449_s17, [#allocation8], %s2463_s27, %s2463_s27, %s2464_s28  }
  0x14   : > { %s403_s25 = sshll.u32 %s3171_s5, 4  ;;  %s429_s19 = sshll.u32 %s3153_s7, 4  ;;  %s404_s25 = int_to_ptr.hbm [resolvable:$true] %s403_s25  ;;  %s430_s19 = int_to_ptr.hbm [resolvable:$true] %s429_s19 }
  0x15   : > { %2206 = dma.hbm_to_vmem [thread:$0]  (!%p2579_p5), %s404_s25, 2048, %s406_s6, [#allocation3], %s2463_s27, %s2463_s27, %s2464_s28  }
  0x16   : > { %s463_s20 = sshll.u32 %s3157_s11, 4  ;;  %s2466_s29 = smov [#allocation6]   ;;  %s464_s20 = int_to_ptr.hbm [resolvable:$true] %s463_s20 }
  0x17   : > { %s431_s17 = sshll.u32 %s2466_s29, 4  ;;  %s2467_s9 = smov [#allocation9]   ;;  %s432_s17 = int_to_ptr.vmem [resolvable:$true] %s431_s17 }
  0x18   : > { %2212 = dma.hbm_to_vmem [thread:$0]  (!%p2579_p5), %s430_s19, 2048, %s432_s17, [#allocation5], %s2463_s27, %s2463_s27, %s2464_s28  }
  0x19   : > { %s465_s22 = sshll.u32 %s2467_s9, 4  ;;  %s2468_s16 = smov 256   ;;  %s466_s22 = int_to_ptr.vmem [resolvable:$true] %s465_s22 }
  0x1a   : > { %s2469_s5 = smov 16   ;;  %s480_s21 = sshll.u32 %s3159_s13, 4  ;;  %s481_s21 = int_to_ptr.hbm [resolvable:$true] %s480_s21 }
  0x1b   : > { %2218 = dma.hbm_to_vmem [thread:$0]  (!%p2579_p5), %s464_s20, 4096, %s466_s22, [#allocation8], %s2468_s16, %s2468_s16, %s2469_s5  }
  0x1c   : > { %s2470_s26 = smov [#allocation10]   ;;  %510 = sbr.rel (%p2568_p3) target bundleno = 1251 (0x4e3), region = 80 }
  0x1d   : > { %s482_s29 = sshll.u32 %s2470_s26, 4  ;;  %s483_s29 = int_to_ptr.vmem [resolvable:$true] %s482_s29 }
  0x1e   : > { %2221 = dma.hbm_to_vmem [thread:$0]  (!%p2579_p5), %s481_s21, 4096, %s483_s29, [#allocation11], %s2463_s27, %s2463_s27, %s2464_s28  }
  0x21   : > { %2442 = dma.done.wait (%p2564_p2), [#allocation3], 2048  }
  0x22   : > { %2444 = vsyncadd (%p2564_p2), [#allocation3], 4294965248 }
  0x23   : > { %2446 = dma.done.wait (%p2564_p2), [#allocation5], 2064  }
  0x24   : > { %2448 = vsyncadd (%p2564_p2), [#allocation5], 4294965232 }
  0x25   : > { %2450 = dma.done.wait (%p2564_p2), [#allocation8], 6144  }
  0x26   : > { %2452 = vsyncadd (%p2564_p2), [#allocation8], 4294961152 }
  0x27   : > { %2454 = dma.done.wait (%p2564_p2), [#allocation11], 4096  }
  0x28   : > { %2456 = vsyncadd (%p2564_p2), [#allocation11], 4294963200  ;;  %s3172_s5 = sadd.s32 4294967295, %s2459_s18   ;;  %v618_v0 = vld [vmem:[%s3147_s1 + $0x30] sm:$0xff]  ;;  %v616_v1 = vld [vmem:[%s3147_s1 + $0x20] sm:$0xff]  ;;  %vm626_vm0 = vcmask 261120  }
  0x29   : > { %s2093_s24 = sshll.u32 %s3172_s5, 4  ;;  %687 = vmatpush.msra.mxu0 %v618_v0  ;;  %v614_v2 = vld [vmem:[%s3147_s1 + $0x10] sm:$0xff]  ;;  %v612_v3 = vld [vmem:[%s3147_s1] sm:$0xff]  ;;  %v916_v13 = vld [vmem:[%s3149_s3 + $0x78] sm:$0xff] }
  0x2a   : > { %p585_p6 = scmp.lt.s32.totalorder %s2093_s24, 31  ;;  %v915_v14 = vld [vmem:[%s3149_s3 + $0x70] sm:$0xff]  ;;  %937 = vmatpush.msra.mxu2 %v916_v13  ;;  %2131 = vmatpush.msra.mxu3 %v916_v13  ;;  %v914_v16 = vld [vmem:[%s3149_s3 + $0x68] sm:$0xff]  ;;  %v913_v17 = vld [vmem:[%s3149_s3 + $0x60] sm:$0xff] }
  0x2b   : > { %688 = vmatpush.msra.mxu0 %v616_v1  ;;  %v912_v18 = vld [vmem:[%s3149_s3 + $0x58] sm:$0xff]  ;;  %v911_v19 = vld [vmem:[%s3149_s3 + $0x50] sm:$0xff]  ;;  %v910_v21 = vld [vmem:[%s3149_s3 + $0x48] sm:$0xff] }
  0x2c   : > { %s3174_s24 = smov (!%p585_p6, %s2093_s24), 31  ;;  %938 = vmatpush.msra.mxu2 %v915_v14  ;;  %2132 = vmatpush.msra.mxu3 %v915_v14  ;;  %v909_v22 = vld [vmem:[%s3149_s3 + $0x40] sm:$0xff]  ;;  %v908_v23 = vld [vmem:[%s3149_s3 + $0x38] sm:$0xff]  ;;  %v907_v25 = vld [vmem:[%s3149_s3 + $0x30] sm:$0xff] }
  0x2d   : > { %s2094_s30 = sshll.u32 %s3174_s24, 3  ;;  %689 = vmatpush.msra.mxu0 %v614_v2  ;;  %v619_v24 = vld [vmem:[%s3147_s1 + $0x38] sm:$0xff]  ;;  %v906_v27 = vld [vmem:[%s3149_s3 + $0x28] sm:$0xff]  ;;  %v905_v29 = vld [vmem:[%s3149_s3 + $0x20] sm:$0xff] }
  0x2e   : > { %s2656_s16 = scalar_lea.vmem %s3146_s0, %s2094_s30  ;;  %939 = vmatpush.msra.mxu2 %v914_v16  ;;  %2133 = vmatpush.msra.mxu3 %v914_v16  ;;  %v617_v28 = vld [vmem:[%s3147_s1 + $0x28] sm:$0xff]  ;;  %v615_v30 = vld [vmem:[%s3147_s1 + $0x18] sm:$0xff]  ;;  %v903_v34 = vld [vmem:[%s3149_s3 + $0x10] sm:$0xff]  ;;  %s3109_s25 = scalar_lea.vmem %s3161_s15, %s2094_s30 }
  0x2f   : > { %v2662_v4 = vld [vmem:[%s2656_s16] sm:$0xff]  ;;  %690 = vmatpush.msra.mxu0 %v612_v3  ;;  %v2667_v5 = vld [vmem:[%s2656_s16 + $0x8] sm:$0xff]  ;;  %v2672_v6 = vld [vmem:[%s2656_s16 + $0x10] sm:$0xff]  ;;  %752 = vmatpush.msra.mxu1 %v619_v24 }
  0x30   : > { %2097 = vmatmul.msk.f32.vlgmr.msra.gmra.mxu0 %vm626_vm0, %v2662_v4  ;;  %v2677_v7 = vld [vmem:[%s2656_s16 + $0x18] sm:$0xff]  ;;  %v2682_v8 = vld [vmem:[%s2656_s16 + $0x20] sm:$0xff]  ;;  %v2687_v9 = vld [vmem:[%s2656_s16 + $0x28] sm:$0xff]  ;;  %940 = vmatpush.msra.mxu2 %v913_v17 }
  0x31   : > { %v2692_v10 = vld [vmem:[%s2656_s16 + $0x30] sm:$0xff]  ;;  %v2697_v11 = vld [vmem:[%s2656_s16 + $0x38] sm:$0xff]  ;;  %v2702_v12 = vld [vmem:[%s2656_s16 + $0x40] sm:$0xff]  ;;  %2134 = vmatpush.msra.mxu3 %v913_v17  ;;  %753 = vmatpush.msra.mxu1 %v617_v28 }
  0x32   : > { %v2713_v15 = vld [vmem:[%s2656_s16 + $0x48] sm:$0xff]  ;;  %941 = vmatpush.msra.mxu2 %v912_v18  ;;  %v2730_v20 = vld [vmem:[%s2656_s16 + $0x50] sm:$0xff]  ;;  %v2750_v26 = vld [vmem:[%s2656_s16 + $0x58] sm:$0xff] }
  0x33   : > { %2135 = vmatpush.msra.mxu3 %v912_v18  ;;  %v904_v31 = vld [vmem:[%s3149_s3 + $0x18] sm:$0xff]  ;;  %754 = vmatpush.msra.mxu1 %v615_v30  ;;  %v613_v32 = vld [vmem:[%s3147_s1 + $0x8] sm:$0xff]  ;;  %v2773_v33 = vld [vmem:[%s2656_s16 + $0x60] sm:$0xff] }
  0x34   : > { %942 = vmatpush.msra.mxu2 %v911_v19  ;;  %v902_v35 = vld [vmem:[%s3149_s3 + $0x8] sm:$0xff]  ;;  %v901_v36 = vld [vmem:[%s3149_s3] sm:$0xff]  ;;  %v2796_v38 = vld [vmem:[%s2656_s16 + $0x70] sm:$0xff] }
  0x35   : > { %2136 = vmatpush.msra.mxu3 %v911_v19  ;;  %755 = vmatpush.msra.mxu1 %v613_v32  ;;  %v2789_v37 = vld [vmem:[%s2656_s16 + $0x68] sm:$0xff]  ;;  %v2803_v39 = vld [vmem:[%s2656_s16 + $0x78] sm:$0xff]  ;;  %v2810_v40 = vld [vmem:[%s3148_s2] sm:$0x3] }
  0x36   : > { %943 = vmatpush.msra.mxu2 %v910_v21  ;;  %2113 = vmatmul.msk.f32.vlgmr.msra.gmra.mxu1 %vm626_vm0, %v2662_v4  ;;  %v2815_v41 = vperm.slane %v2810_v40, 0  ;;  %v931_v13 = vld [vmem:[%s3149_s3 + $0xf0] sm:$0xff]  ;;  %v930_v14 = vld [vmem:[%s3149_s3 + $0xe8] sm:$0xff]  ;;  %v929_v17 = vld [vmem:[%s3149_s3 + $0xe0] sm:$0xff] }
  0x37   : > { %2137 = vmatpush.msra.mxu3 %v910_v21  ;;  %v927_v21 = vld [vmem:[%s3149_s3 + $0xd0] sm:$0xff]  ;;  %v924_v28 = vld [vmem:[%s3149_s3 + $0xb8] sm:$0xff]  ;;  %v922_v32 = vld [vmem:[%s3149_s3 + $0xa8] sm:$0xff] }
  0x38   : > { %2098 = vmatmul.msk.f32.gmra.mxu0 %vm626_vm0, %v2667_v5  ;;  %944 = vmatpush.msra.mxu2 %v909_v22  ;;  %v923_v30 = vld [vmem:[%s3149_s3 + $0xb0] sm:$0xff] }
  0x39   : > { %2138 = vmatpush.msra.mxu3 %v909_v22 }
  0x3a   : > { %945 = vmatpush.msra.mxu2 %v908_v23 }
  0x3b   : > { %2139 = vmatpush.msra.mxu3 %v908_v23  ;;  %v926_v23 = vld [vmem:[%s3149_s3 + $0xc8] sm:$0xff] }
  0x3c   : > { %946 = vmatpush.msra.mxu2 %v907_v25 }
  0x3d   : > { %2140 = vmatpush.msra.mxu3 %v907_v25 }
  0x3e   : > { %947 = vmatpush.msra.mxu2 %v906_v27  ;;  %2114 = vmatmul.msk.f32.gmra.mxu1 %vm626_vm0, %v2667_v5 }
  0x3f   : > { %2141 = vmatpush.msra.mxu3 %v906_v27  ;;  %v925_v27 = vld [vmem:[%s3149_s3 + $0xc0] sm:$0xff] }
  0x40   : > { %2099 = vmatmul.msk.f32.gmra.mxu0 %vm626_vm0, %v2672_v6  ;;  %948 = vmatpush.msra.mxu2 %v905_v29 }
  0x41   : > { %2142 = vmatpush.msra.mxu3 %v905_v29 }
  0x42   : > { %949 = vmatpush.msra.mxu2 %v904_v31 }
  0x43   : > { %2143 = vmatpush.msra.mxu3 %v904_v31 }
  0x44   : > { %950 = vmatpush.msra.mxu2 %v903_v34 }
  0x45   : > { %2144 = vmatpush.msra.mxu3 %v903_v34 }
  0x46   : > { %951 = vmatpush.msra.mxu2 %v902_v35  ;;  %2115 = vmatmul.msk.f32.gmra.mxu1 %vm626_vm0, %v2672_v6 }
  0x47   : > { %2145 = vmatpush.msra.mxu3 %v902_v35  ;;  %v921_v35 = vld [vmem:[%s3149_s3 + $0xa0] sm:$0xff] }
  0x48   : > { %2100 = vmatmul.msk.f32.gmra.mxu0 %vm626_vm0, %v2677_v7  ;;  %952 = vmatpush.msra.mxu2 %v901_v36 }
  0x49   : > { %2146 = vmatpush.msra.mxu3 %v901_v36  ;;  %v920_v36 = vld [vmem:[%s3149_s3 + $0x98] sm:$0xff] }
  0x4e   : > { %2116 = vmatmul.msk.f32.gmra.mxu1 %vm626_vm0, %v2677_v7 }
  0x50   : > { %2101 = vmatmul.msk.f32.gmra.mxu0 %vm626_vm0, %v2682_v8 }
  0x56   : > { %2117 = vmatmul.msk.f32.gmra.mxu1 %vm626_vm0, %v2682_v8 }
  0x58   : > { %2102 = vmatmul.msk.f32.gmra.mxu0 %vm626_vm0, %v2687_v9 }
  0x5e   : > { %2118 = vmatmul.msk.f32.gmra.mxu1 %vm626_vm0, %v2687_v9 }
  0x60   : > { %2103 = vmatmul.msk.f32.gmra.mxu0 %vm626_vm0, %v2692_v10 }
  0x66   : > { %2119 = vmatmul.msk.f32.gmra.mxu1 %vm626_vm0, %v2692_v10  ;;  %v932_v10 = vld [vmem:[%s3149_s3 + $0xf8] sm:$0xff] }
  0x67   : > { %1002 = vmatpush.msrb.mxu3 %v932_v10 }
  0x68   : > { %2104 = vmatmul.msk.f32.gmra.mxu0 %vm626_vm0, %v2697_v11 }
  0x69   : > { %1003 = vmatpush.msrb.mxu3 %v931_v13 }
  0x6b   : > { %1004 = vmatpush.msrb.mxu3 %v930_v14 }
  0x6d   : > { %1005 = vmatpush.msrb.mxu3 %v929_v17 }
  0x6e   : > { %2120 = vmatmul.msk.f32.gmra.mxu1 %vm626_vm0, %v2697_v11 }
  0x70   : > { %2105 = vmatmul.msk.f32.gmra.mxu0 %vm626_vm0, %v2702_v12 }
  0x76   : > { %2121 = vmatmul.msk.f32.gmra.mxu1 %vm626_vm0, %v2702_v12 }
  0x78   : > { %2106 = vmatmul.msk.f32.gmra.mxu0 %vm626_vm0, %v2713_v15 }
  0x7e   : > { %2122 = vmatmul.msk.f32.gmra.mxu1 %vm626_vm0, %v2713_v15 }
  0x80   : > { %2107 = vmatmul.msk.f32.gmra.mxu0 %vm626_vm0, %v2730_v20 }
  0x86   : > { %2123 = vmatmul.msk.f32.gmra.mxu1 %vm626_vm0, %v2730_v20  ;;  %v928_v20 = vld [vmem:[%s3149_s3 + $0xd8] sm:$0xff] }
  0x87   : > { %1006 = vmatpush.msrb.mxu3 %v928_v20 }
  0x88   : > { %2108 = vmatmul.msk.f32.gmra.mxu0 %vm626_vm0, %v2750_v26 }
  0x89   : > { %1007 = vmatpush.msrb.mxu3 %v927_v21  ;;  %v1124_v21 = vld [vmem:[#allocation2 + $0x48] sm:$0xff] }
  0x8b   : > { %1008 = vmatpush.msrb.mxu3 %v926_v23 }
  0x8d   : > { %1009 = vmatpush.msrb.mxu3 %v925_v27 }
  0x8e   : > { %2124 = vmatmul.msk.f32.gmra.mxu1 %vm626_vm0, %v2750_v26 }
  0x8f   : > { %1010 = vmatpush.msrb.mxu3 %v924_v28 }
  0x90   : > { %2109 = vmatmul.msk.f32.gmra.mxu0 %vm626_vm0, %v2773_v33 }
  0x91   : > { %1011 = vmatpush.msrb.mxu3 %v923_v30 }
  0x93   : > { %1012 = vmatpush.msrb.mxu3 %v922_v32 }
  0x95   : > { %1013 = vmatpush.msrb.mxu3 %v921_v35 }
  0x96   : > { %2125 = vmatmul.msk.f32.gmra.mxu1 %vm626_vm0, %v2773_v33 }
  0x97   : > { %1014 = vmatpush.msrb.mxu3 %v920_v36  ;;  %v1121_v36 = vld [vmem:[#allocation2 + $0x30] sm:$0xff] }
  0x98   : > { %2110 = vmatmul.msk.f32.gmra.mxu0 %vm626_vm0, %v2789_v37 }
  0x9e   : > { %2126 = vmatmul.msk.f32.gmra.mxu1 %vm626_vm0, %v2789_v37 }
  0xa0   : > { %2111 = vmatmul.msk.f32.gmra.mxu0 %vm626_vm0, %v2796_v38 }
  0xa6   : > { %2127 = vmatmul.msk.f32.gmra.mxu1 %vm626_vm0, %v2796_v38 }
  0xa8   : > { %2112 = vmatmul.msk.f32.gmra.mxu0 %vm626_vm0, %v2803_v39 }
  0xad   : > { %v692_v42 = vpop.f32.mrf.mxu0 }
  0xae   : > { %v693_v43 = vadd.f32 %v692_v42, %v2815_v41  ;;  %2128 = vmatmul.msk.f32.gmra.mxu1 %vm626_vm0, %v2803_v39  ;;  %v918_v39 = vld [vmem:[%s3149_s3 + $0x88] sm:$0xff] }
  0xb0   : > { %vm805_vm1 = vcmp.gt.f32.partialorder %v693_v43, 0.0  ;;  %v837_v44 = vmul.f32 0.01, %v693_v43 }
  0xb2   : > { %v869_v45 = vsel %vm805_vm1, %v693_v43, %v837_v44  ;;  %v919_v43 = vld [vmem:[%s3149_s3 + $0x90] sm:$0xff] }
  0xb3   : > { %953 = vmatmul.f32.vlgmr.msra.gmra.mxu2 %v869_v45  ;;  %v757_v42 = vpop.f32.mrf.mxu1  ;;  %1015 = vmatpush.msrb.mxu3 %v919_v43  ;;  %v917_v45 = vld [vmem:[%s3149_s3 + $0x80] sm:$0xff]  ;;  %v1120_v43 = vld [vmem:[#allocation2 + $0x28] sm:$0xff] }
  0xb5   : > { %v695_v46 = vpop.f32.mrf.mxu0  ;;  %1016 = vmatpush.msrb.mxu3 %v918_v39 }
  0xb6   : > { %v696_v47 = vadd.f32 %v695_v46, %v2815_v41 }
  0xb7   : > { %1017 = vmatpush.msrb.mxu3 %v917_v45 }
  0xb8   : > { %vm807_vm2 = vcmp.gt.f32.partialorder %v696_v47, 0.0  ;;  %v839_v48 = vmul.f32 0.01, %v696_v47 }
  0xba   : > { %v871_v49 = vsel %vm807_vm2, %v696_v47, %v839_v48 }
  0xbb   : > { %956 = vmatmul.f32.gmra.mxu2 %v871_v49  ;;  %v760_v49 = vpop.f32.mrf.mxu1 }
  0xbd   : > { %v698_v50 = vpop.f32.mrf.mxu0 }
  0xbe   : > { %v699_v51 = vadd.f32 %v698_v50, %v2815_v41 }
  0xc0   : > { %vm809_vm3 = vcmp.gt.f32.partialorder %v699_v51, 0.0  ;;  %v841_v52 = vmul.f32 0.01, %v699_v51 }
  0xc2   : > { %v873_v53 = vsel %vm809_vm3, %v699_v51, %v841_v52 }
  0xc3   : > { %959 = vmatmul.f32.gmra.mxu2 %v873_v53 }
  0xc5   : > { %v701_v54 = vpop.f32.mrf.mxu0 }
  0xc6   : > { %v702_v55 = vadd.f32 %v701_v54, %v2815_v41  ;;  %v1130_v54 = vld [vmem:[#allocation2 + $0x78] sm:$0xff] }
  0xc7   : > { %1135 = vmatpush.msrb.mxu0 %v1130_v54 }
  0xc8   : > { %vm811_vm4 = vcmp.gt.f32.partialorder %v702_v55, 0.0  ;;  %v843_v56 = vmul.f32 0.01, %v702_v55 }
  0xca   : > { %v875_v57 = vsel %vm811_vm4, %v702_v55, %v843_v56  ;;  %v763_v56 = vpop.f32.mrf.mxu1 }
  0xcb   : > { %962 = vmatmul.f32.gmra.mxu2 %v875_v57 }
  0xcd   : > { %v704_v58 = vpop.f32.mrf.mxu0 }
  0xce   : > { %v705_v59 = vadd.f32 %v704_v58, %v2815_v41 }
  0xd0   : > { %vm813_vm5 = vcmp.gt.f32.partialorder %v705_v59, 0.0  ;;  %v845_v60 = vmul.f32 0.01, %v705_v59 }
  0xd2   : > { %v877_v61 = vsel %vm813_vm5, %v705_v59, %v845_v60  ;;  %v1129_v60 = vld [vmem:[#allocation2 + $0x70] sm:$0xff] }
  0xd3   : > { %965 = vmatmul.f32.gmra.mxu2 %v877_v61  ;;  %1136 = vmatpush.msrb.mxu0 %v1129_v60 }
  0xd5   : > { %v707_v62 = vpop.f32.mrf.mxu0 }
  0xd6   : > { %v708_v63 = vadd.f32 %v707_v62, %v2815_v41 }
  0xd8   : > { %vm815_vm6 = vcmp.gt.f32.partialorder %v708_v63, 0.0  ;;  %v847_v0 = vmul.f32 0.01, %v708_v63 }
  0xda   : > { %v879_v1 = vsel %vm815_vm6, %v708_v63, %v847_v0  ;;  %v2906_v63 = vperm.slane %v2810_v40, 1  ;;  %v766_v0 = vpop.f32.mrf.mxu1 }
  0xdb   : > { %968 = vmatmul.f32.gmra.mxu2 %v879_v1 }
  0xdc   : > { %v767_v14 = vadd.f32 %v766_v0, %v2906_v63 }
  0xdd   : > { %v710_v2 = vpop.f32.mrf.mxu0 }
  0xde   : > { %v711_v3 = vadd.f32 %v710_v2, %v2815_v41  ;;  %v758_v2 = vadd.f32 %v757_v42, %v2906_v63  ;;  %vm812_vm4 = vcmp.gt.f32.partialorder %v767_v14, 0.0 }
  0xe0   : > { %vm817_vm7 = vcmp.gt.f32.partialorder %v711_v3, 0.0  ;;  %v849_v4 = vmul.f32 0.01, %v711_v3  ;;  %vm806_vm1 = vcmp.gt.f32.partialorder %v758_v2, 0.0 }
  0xe2   : > { %v881_v5 = vsel %vm817_vm7, %v711_v3, %v849_v4  ;;  %v1128_v4 = vld [vmem:[#allocation2 + $0x68] sm:$0xff] }
  0xe3   : > { %971 = vmatmul.f32.gmra.mxu2 %v881_v5  ;;  %1137 = vmatpush.msrb.mxu0 %v1128_v4  ;;  %v838_v5 = vmul.f32 0.01, %v758_v2 }
  0xe5   : > { %v713_v6 = vpop.f32.mrf.mxu0 }
  0xe6   : > { %v714_v7 = vadd.f32 %v713_v6, %v2815_v41  ;;  %v769_v6 = vpop.f32.mrf.mxu1 }
  0xe8   : > { %vm819_vm8 = vcmp.gt.f32.partialorder %v714_v7, 0.0  ;;  %v851_v8 = vmul.f32 0.01, %v714_v7 }
  0xea   : > { %v883_v9 = vsel %vm819_vm8, %v714_v7, %v851_v8  ;;  %v761_v7 = vadd.f32 %v760_v49, %v2906_v63  ;;  %v870_v8 = vsel %vm806_vm1, %v758_v2, %v838_v5  ;;  %v1115_v2 = vld [vmem:[#allocation2] sm:$0xff] }
  0xeb   : > { %974 = vmatmul.f32.gmra.mxu2 %v883_v9  ;;  %v764_v9 = vadd.f32 %v763_v56, %v2906_v63 }
  0xec   : > { %v840_v40 = vmul.f32 0.01, %v761_v7  ;;  %vm808_vm2 = vcmp.gt.f32.partialorder %v761_v7, 0.0 }
  0xed   : > { %v716_v11 = vpop.f32.mrf.mxu0  ;;  %v842_v13 = vmul.f32 0.01, %v764_v9  ;;  %vm810_vm3 = vcmp.gt.f32.partialorder %v764_v9, 0.0 }
  0xee   : > { %v717_v12 = vadd.f32 %v716_v11, %v2815_v41  ;;  %v872_v10 = vsel %vm808_vm2, %v761_v7, %v840_v40  ;;  %v772_v11 = vpop.f32.mrf.mxu1 }
  0xf0   : > { %vm821_vm9 = vcmp.gt.f32.partialorder %v717_v12, 0.0  ;;  %v853_v15 = vmul.f32 0.01, %v717_v12 }
  0xf2   : > { %v885_v16 = vsel %vm821_vm9, %v717_v12, %v853_v15  ;;  %v1126_v12 = vld [vmem:[#allocation2 + $0x58] sm:$0xff]  ;;  %v874_v15 = vsel %vm810_vm3, %v764_v9, %v842_v13 }
  0xf3   : > { %977 = vmatmul.f32.gmra.mxu2 %v885_v16  ;;  %v1125_v16 = vld [vmem:[#allocation2 + $0x50] sm:$0xff] }
  0xf5   : > { %v719_v18 = vpop.f32.mrf.mxu0 }
  0xf6   : > { %v720_v19 = vadd.f32 %v719_v18, %v2815_v41  ;;  %v775_v17 = vpop.f32.mrf.mxu1  ;;  %v844_v18 = vmul.f32 0.01, %v767_v14 }
  0xf8   : > { %vm823_vm10 = vcmp.gt.f32.partialorder %v720_v19, 0.0  ;;  %v855_v22 = vmul.f32 0.01, %v720_v19  ;;  %v876_v20 = vsel %vm812_vm4, %v767_v14, %v844_v18 }
  0xfa   : > { %v887_v24 = vsel %vm823_vm10, %v720_v19, %v855_v22  ;;  %v770_v19 = vadd.f32 %v769_v6, %v2906_v63 }
  0xfb   : > { %980 = vmatmul.f32.gmra.mxu2 %v887_v24  ;;  %v773_v24 = vadd.f32 %v772_v11, %v2906_v63 }
  0xfc   : > { %v846_v22 = vmul.f32 0.01, %v770_v19  ;;  %vm814_vm5 = vcmp.gt.f32.partialorder %v770_v19, 0.0 }
  0xfd   : > { %v722_v25 = vpop.f32.mrf.mxu0  ;;  %v848_v27 = vmul.f32 0.01, %v773_v24  ;;  %vm816_vm6 = vcmp.gt.f32.partialorder %v773_v24, 0.0 }
  0xfe   : > { %v723_v26 = vadd.f32 %v722_v25, %v2815_v41  ;;  %v778_v23 = vpop.f32.mrf.mxu1  ;;  %v878_v25 = vsel %vm814_vm5, %v770_v19, %v846_v22  ;;  %v2937_v22 = vld [vmem:[%s3150_s4] ss:$0 sm:$0xff] }
  0xff   : > { %v880_v30 = vsel %vm816_vm6, %v773_v24, %v848_v27 }
 0x100   : > { %vm825_vm11 = vcmp.gt.f32.partialorder %v723_v26, 0.0  ;;  %v857_v29 = vmul.f32 0.01, %v723_v26 }
 0x102   : > { %v889_v31 = vsel %vm825_vm11, %v723_v26, %v857_v29  ;;  %v1123_v26 = vld [vmem:[#allocation2 + $0x40] sm:$0xff]  ;;  %v776_v29 = vadd.f32 %v775_v17, %v2906_v63  ;;  %v1262_v17 = vld [vmem:[#allocation6 + $0x70] sm:$0xff] }
 0x103   : > { %983 = vmatmul.f32.gmra.mxu2 %v889_v31  ;;  %v1122_v31 = vld [vmem:[#allocation2 + $0x38] sm:$0xff] }
 0x104   : > { %v850_v32 = vmul.f32 0.01, %v776_v29  ;;  %vm818_vm7 = vcmp.gt.f32.partialorder %v776_v29, 0.0 }
 0x105   : > { %v725_v33 = vpop.f32.mrf.mxu0 }
 0x106   : > { %v726_v34 = vadd.f32 %v725_v33, %v2815_v41  ;;  %v781_v28 = vpop.f32.mrf.mxu1  ;;  %v779_v33 = vadd.f32 %v778_v23, %v2906_v63 }
 0x108   : > { %vm827_vm12 = vcmp.gt.f32.partialorder %v726_v34, 0.0  ;;  %v859_v37 = vmul.f32 0.01, %v726_v34  ;;  %vm820_vm8 = vcmp.gt.f32.partialorder %v779_v33, 0.0 }
 0x10a   : > { %v891_v38 = vsel %vm827_vm12, %v726_v34, %v859_v37  ;;  %v882_v34 = vsel %vm818_vm7, %v776_v29, %v850_v32  ;;  %v852_v37 = vmul.f32 0.01, %v779_v33 }
 0x10b   : > { %986 = vmatmul.f32.vlgmr.msra.gmra.mxu3 %v891_v38  ;;  %v782_v38 = vadd.f32 %v781_v28, %v2906_v63 }
 0x10c   : > { %v884_v42 = vsel %vm820_vm8, %v779_v33, %v852_v37  ;;  %v1259_v33 = vld [vmem:[#allocation6 + $0x58] sm:$0xff] }
 0x10d   : > { %v728_v44 = vpop.f32.mrf.mxu0  ;;  %vm822_vm9 = vcmp.gt.f32.partialorder %v782_v38, 0.0 }
 0x10e   : > { %v729_v46 = vadd.f32 %v728_v44, %v2815_v41  ;;  %v784_v35 = vpop.f32.mrf.mxu1  ;;  %v854_v44 = vmul.f32 0.01, %v782_v38 }
 0x10f   : > { %v785_v45 = vadd.f32 %v784_v35, %v2906_v63 }
 0x110   : > { %vm829_vm13 = vcmp.gt.f32.partialorder %v729_v46, 0.0  ;;  %v861_v47 = vmul.f32 0.01, %v729_v46 }
 0x111   : > { %vm824_vm10 = vcmp.gt.f32.partialorder %v785_v45, 0.0 }
 0x112   : > { %v893_v48 = vsel %vm829_vm13, %v729_v46, %v861_v47  ;;  %v886_v46 = vsel %vm822_vm9, %v782_v38, %v854_v44  ;;  %v1119_v47 = vld [vmem:[#allocation2 + $0x20] sm:$0xff] }
 0x113   : > { %989 = vmatmul.f32.gmra.mxu3 %v893_v48  ;;  %v856_v48 = vmul.f32 0.01, %v785_v45 }
 0x115   : > { %v731_v50 = vpop.f32.mrf.mxu0 }
 0x116   : > { %v732_v51 = vadd.f32 %v731_v50, %v2815_v41  ;;  %v787_v39 = vpop.f32.mrf.mxu1 }
 0x117   : > { %v788_v50 = vadd.f32 %v787_v39, %v2906_v63 }
 0x118   : > { %vm831_vm14 = vcmp.gt.f32.partialorder %v732_v51, 0.0  ;;  %v863_v52 = vmul.f32 0.01, %v732_v51 }
 0x119   : > { %vm826_vm11 = vcmp.gt.f32.partialorder %v788_v50, 0.0 }
 0x11a   : > { %v895_v53 = vsel %vm831_vm14, %v732_v51, %v863_v52  ;;  %v888_v51 = vsel %vm824_vm10, %v785_v45, %v856_v48  ;;  %v1118_v52 = vld [vmem:[#allocation2 + $0x18] sm:$0xff]  ;;  %v1257_v48 = vld [vmem:[#allocation6 + $0x48] sm:$0xff] }
 0x11b   : > { %992 = vmatmul.f32.gmra.mxu3 %v895_v53  ;;  %v858_v53 = vmul.f32 0.01, %v788_v50 }
 0x11d   : > { %v734_v55 = vpop.f32.mrf.mxu0  ;;  %v890_v56 = vsel %vm826_vm11, %v788_v50, %v858_v53 }
 0x11e   : > { %v735_v57 = vadd.f32 %v734_v55, %v2815_v41  ;;  %v790_v49 = vpop.f32.mrf.mxu1 }
 0x11f   : > { %v791_v55 = vadd.f32 %v790_v49, %v2906_v63 }
 0x120   : > { %vm833_vm15 = vcmp.gt.f32.partialorder %v735_v57, 0.0  ;;  %v865_v58 = vmul.f32 0.01, %v735_v57 }
 0x121   : > { %vm828_vm12 = vcmp.gt.f32.partialorder %v791_v55, 0.0 }
 0x122   : > { %v897_v59 = vsel %vm833_vm15, %v735_v57, %v865_v58  ;;  %v1117_v57 = vld [vmem:[#allocation2 + $0x10] sm:$0xff]  ;;  %v860_v58 = vmul.f32 0.01, %v791_v55 }
 0x123   : > { %995 = vmatmul.f32.gmra.mxu3 %v897_v59 }
 0x124   : > { %v892_v60 = vsel %vm828_vm12, %v791_v55, %v860_v58  ;;  %v1256_v55 = vld [vmem:[#allocation6 + $0x40] sm:$0xff] }
 0x125   : > { %v737_v61 = vpop.f32.mrf.mxu0 }
 0x126   : > { %v738_v62 = vadd.f32 %v737_v61, %v2815_v41  ;;  %v1127_v41 = vld [vmem:[#allocation2 + $0x60] sm:$0xff]  ;;  %v793_v54 = vpop.f32.mrf.mxu1 }
 0x127   : > { %1138 = vmatpush.msrb.mxu0 %v1127_v41  ;;  %v794_v59 = vadd.f32 %v793_v54, %v2906_v63 }
 0x128   : > { %vm835_vm0 = vcmp.gt.f32.partialorder %v738_v62, 0.0  ;;  %v867_v1 = vmul.f32 0.01, %v738_v62 }
 0x129   : > { %1139 = vmatpush.msrb.mxu0 %v1126_v12  ;;  %vm830_vm13 = vcmp.gt.f32.partialorder %v794_v59, 0.0  ;;  %v1263_v12 = vld [vmem:[#allocation6 + $0x78] sm:$0xff] }
 0x12a   : > { %v899_v3 = vsel %vm835_vm0, %v738_v62, %v867_v1  ;;  %v1116_v62 = vld [vmem:[#allocation2 + $0x8] sm:$0xff]  ;;  %v862_v1 = vmul.f32 0.01, %v794_v59  ;;  %1268 = vmatpush.msrb.mxu1 %v1263_v12 }
 0x12b   : > { %998 = vmatmul.f32.gmra.mxu3 %v899_v3  ;;  %1140 = vmatpush.msrb.mxu0 %v1125_v16 }
 0x12c   : > { %v894_v4 = vsel %vm830_vm13, %v794_v59, %v862_v1  ;;  %1269 = vmatpush.msrb.mxu1 %v1262_v17 }
 0x12d   : > { %1141 = vmatpush.msrb.mxu0 %v1124_v21  ;;  %v1261_v21 = vld [vmem:[#allocation6 + $0x68] sm:$0xff] }
 0x12e   : > { %v796_v61 = vpop.f32.mrf.mxu1  ;;  %1270 = vmatpush.msrb.mxu1 %v1261_v21 }
 0x12f   : > { %1142 = vmatpush.msrb.mxu0 %v1123_v26  ;;  %v797_v3 = vadd.f32 %v796_v61, %v2906_v63  ;;  %v1260_v26 = vld [vmem:[#allocation6 + $0x60] sm:$0xff] }
 0x130   : > { %1271 = vmatpush.msrb.mxu1 %v1260_v26 }
 0x131   : > { %1143 = vmatpush.msrb.mxu0 %v1122_v31  ;;  %v864_v7 = vmul.f32 0.01, %v797_v3  ;;  %vm832_vm14 = vcmp.gt.f32.partialorder %v797_v3, 0.0 }
 0x132   : > { %1272 = vmatpush.msrb.mxu1 %v1259_v33 }
 0x133   : > { %1018 = vmatmul.f32.vlgmr.msrb.gmra.mxu3 %v870_v8  ;;  %1144 = vmatpush.msrb.mxu0 %v1121_v36  ;;  %v896_v41 = vsel %vm832_vm14, %v797_v3, %v864_v7 }
 0x135   : > { %1145 = vmatpush.msrb.mxu0 %v1120_v43  ;;  %v1258_v43 = vld [vmem:[#allocation6 + $0x50] sm:$0xff] }
 0x136   : > { %v799_v5 = vpop.f32.mrf.mxu1  ;;  %v954_v40 = vpop.f32.mrf.mxu2  ;;  %1273 = vmatpush.msrb.mxu1 %v1258_v43 }
 0x137   : > { %1146 = vmatpush.msrb.mxu0 %v1119_v47  ;;  %v800_v8 = vadd.f32 %v799_v5, %v2906_v63  ;;  %v955_v23 = vadd.f32 %v2937_v22, %v954_v40 }
 0x138   : > { %1274 = vmatpush.msrb.mxu1 %v1257_v48 }
 0x139   : > { %1147 = vmatpush.msrb.mxu0 %v1118_v52  ;;  %vm834_vm15 = vcmp.gt.f32.partialorder %v800_v8, 0.0 }
 0x13a   : > { %1275 = vmatpush.msrb.mxu1 %v1256_v55 }
 0x13b   : > { %1021 = vmatmul.f32.gmra.mxu3 %v872_v10  ;;  %1148 = vmatpush.msrb.mxu0 %v1117_v57  ;;  %v866_v10 = vmul.f32 0.01, %v800_v8 }
 0x13d   : > { %1149 = vmatpush.msrb.mxu0 %v1116_v62  ;;  %v898_v14 = vsel %vm834_vm15, %v800_v8, %v866_v10  ;;  %v1255_v62 = vld [vmem:[#allocation6 + $0x38] sm:$0xff]  ;;  %v1254_v8 = vld [vmem:[#allocation6 + $0x30] sm:$0xff] }
 0x13e   : > { %v802_v11 = vpop.f32.mrf.mxu1  ;;  %v957_v18 = vpop.f32.mrf.mxu2  ;;  %1276 = vmatpush.msrb.mxu1 %v1255_v62 }
 0x13f   : > { %1150 = vmatpush.msrb.mxu0 %v1115_v2  ;;  %v803_v13 = vadd.f32 %v802_v11, %v2906_v63 }
 0x140   : > { %1277 = vmatpush.msrb.mxu1 %v1254_v8 }
 0x141   : > { %v868_v16 = vmul.f32 0.01, %v803_v13  ;;  %vm836_vm0 = vcmp.gt.f32.partialorder %v803_v13, 0.0 }
 0x143   : > { %1024 = vmatmul.f32.gmra.mxu3 %v874_v15  ;;  %v900_v19 = vsel %vm836_vm0, %v803_v13, %v868_v16 }
 0x146   : > { %v960_v63 = vpop.f32.mrf.mxu2 }
 0x147   : > { %v961_v36 = vadd.f32 %v2937_v22, %v960_v63 }
 0x14b   : > { %1027 = vmatmul.f32.gmra.mxu3 %v876_v20 }
 0x14e   : > { %v963_v29 = vpop.f32.mrf.mxu2 }
 0x14f   : > { %v964_v45 = vadd.f32 %v2937_v22, %v963_v29 }
 0x153   : > { %1030 = vmatmul.f32.gmra.mxu3 %v878_v25 }
 0x156   : > { %v966_v37 = vpop.f32.mrf.mxu2 }
 0x157   : > { %v967_v52 = vadd.f32 %v2937_v22, %v966_v37  ;;  %v1250_v37 = vld [vmem:[#allocation6 + $0x10] sm:$0xff] }
 0x15b   : > { %1033 = vmatmul.f32.gmra.mxu3 %v880_v30  ;;  %v958_v30 = vadd.f32 %v2937_v22, %v957_v18 }
 0x15e   : > { %v969_v49 = vpop.f32.mrf.mxu2 }
 0x15f   : > { %v970_v59 = vadd.f32 %v2937_v22, %v969_v49 }
 0x163   : > { %1036 = vmatmul.f32.gmra.mxu3 %v882_v34 }
 0x166   : > { %v972_v57 = vpop.f32.mrf.mxu2 }
 0x16b   : > { %1039 = vmatmul.f32.gmra.mxu3 %v884_v42 }
 0x16e   : > { %v975_v3 = vpop.f32.mrf.mxu2 }
 0x16f   : > { %v976_v10 = vadd.f32 %v2937_v22, %v975_v3  ;;  %v2960_v3 = vld [vmem:[#allocation4] ss:$0 sm:$0xff] }
 0x173   : > { %1042 = vmatmul.f32.gmra.mxu3 %v886_v46 }
 0x176   : > { %v978_v11 = vpop.f32.mrf.mxu2 }
 0x177   : > { %v979_v18 = vadd.f32 %v2937_v22, %v978_v11  ;;  %v1396_v11 = vld [vmem:[#allocation7 + $0x78] sm:$0xff] }
 0x178   : > { %1401 = vmatpush.msrb.mxu2 %v1396_v11 }
 0x17b   : > { %1045 = vmatmul.f32.gmra.mxu3 %v888_v51 }
 0x17e   : > { %v981_v63 = vpop.f32.mrf.mxu2 }
 0x17f   : > { %v982_v26 = vadd.f32 %v2937_v22, %v981_v63 }
 0x183   : > { %1048 = vmatmul.f32.gmra.mxu3 %v890_v56 }
 0x18b   : > { %1051 = vmatmul.f32.gmra.mxu3 %v892_v60 }
 0x18e   : > { %v2921_v0 = vpop.f32.mrf.mxu3 }
 0x193   : > { %1054 = vmatmul.f32.gmra.mxu3 %v894_v4  ;;  %v973_v4 = vadd.f32 %v2937_v22, %v972_v57 }
 0x196   : > { %v2924_v6 = vpop.f32.mrf.mxu3 }
 0x197   : > { %v991_v48 = vadd.f32 %v2937_v22, %v2924_v6 }
 0x19b   : > { %1057 = vmatmul.f32.gmra.mxu3 %v896_v41 }
 0x19e   : > { %v2927_v9 = vpop.f32.mrf.mxu3 }
 0x1a3   : > { %1060 = vmatmul.f32.gmra.mxu3 %v898_v14  ;;  %v1253_v14 = vld [vmem:[#allocation6 + $0x28] sm:$0xff] }
 0x1a4   : > { %1278 = vmatpush.msrb.mxu1 %v1253_v14  ;;  %v1395_v14 = vld [vmem:[#allocation7 + $0x70] sm:$0xff] }
 0x1a5   : > { %1402 = vmatpush.msrb.mxu2 %v1395_v14 }
 0x1a6   : > { %v2930_v15 = vpop.f32.mrf.mxu3 }
 0x1a7   : > { %v997_v57 = vadd.f32 %v2937_v22, %v2930_v15 }
 0x1ab   : > { %1063 = vmatmul.f32.gmra.mxu3 %v900_v19 }
 0x1ae   : > { %v2932_v20 = vpop.f32.mrf.mxu3 }
 0x1b6   : > { %v1019_v24 = vpop.f32.mrf.mxu3 }
 0x1b7   : > { %v1020_v25 = vadd.f32 %v1019_v24, %v955_v23  ;;  %v1252_v24 = vld [vmem:[#allocation6 + $0x20] sm:$0xff] }
 0x1b8   : > { %1279 = vmatpush.msrb.mxu1 %v1252_v24 }
 0x1b9   : > { %vm1067_vm1 = vcmp.gt.f32.partialorder %v1020_v25, 0.0  ;;  %v1083_v27 = vmul.f32 0.01, %v1020_v25 }
 0x1bb   : > { %v1099_v28 = vsel %vm1067_vm1, %v1020_v25, %v1083_v27 }
 0x1bc   : > { %1151 = vmatmul.f32.vlgmr.msrb.gmra.mxu0 %v1099_v28 }
 0x1be   : > { %v1022_v31 = vpop.f32.mrf.mxu3 }
 0x1bf   : > { %v1023_v32 = vadd.f32 %v1022_v31, %v958_v30  ;;  %v1251_v30 = vld [vmem:[#allocation6 + $0x18] sm:$0xff]  ;;  %v984_v31 = vpop.f32.mrf.mxu2 }
 0x1c0   : > { %1280 = vmatpush.msrb.mxu1 %v1251_v30  ;;  %v985_v33 = vadd.f32 %v2937_v22, %v984_v31  ;;  %v1391_v31 = vld [vmem:[#allocation7 + $0x50] sm:$0xff] }
 0x1c1   : > { %vm1068_vm2 = vcmp.gt.f32.partialorder %v1023_v32, 0.0  ;;  %v1084_v34 = vmul.f32 0.01, %v1023_v32 }
 0x1c2   : > { %1281 = vmatpush.msrb.mxu1 %v1250_v37 }
 0x1c3   : > { %v1100_v35 = vsel %vm1068_vm2, %v1023_v32, %v1084_v34 }
 0x1c4   : > { %1154 = vmatmul.f32.gmra.mxu0 %v1100_v35 }
 0x1c6   : > { %v1025_v38 = vpop.f32.mrf.mxu3 }
 0x1c7   : > { %v1026_v42 = vadd.f32 %v1025_v38, %v961_v36 }
 0x1c9   : > { %vm1069_vm3 = vcmp.gt.f32.partialorder %v1026_v42, 0.0  ;;  %v1085_v39 = vmul.f32 0.01, %v1026_v42 }
 0x1cb   : > { %v1101_v44 = vsel %vm1069_vm3, %v1026_v42, %v1085_v39  ;;  %v988_v42 = vadd.f32 %v2937_v22, %v2921_v0  ;;  %v994_v0 = vadd.f32 %v2937_v22, %v2927_v9 }
 0x1cc   : > { %1157 = vmatmul.f32.gmra.mxu0 %v1101_v44 }
 0x1ce   : > { %v1028_v46 = vpop.f32.mrf.mxu3 }
 0x1cf   : > { %v1029_v47 = vadd.f32 %v1028_v46, %v964_v45  ;;  %v1249_v45 = vld [vmem:[#allocation6 + $0x8] sm:$0xff] }
 0x1d0   : > { %1282 = vmatpush.msrb.mxu1 %v1249_v45 }
 0x1d1   : > { %vm1070_vm4 = vcmp.gt.f32.partialorder %v1029_v47, 0.0  ;;  %v1086_v50 = vmul.f32 0.01, %v1029_v47 }
 0x1d3   : > { %v1102_v51 = vsel %vm1070_vm4, %v1029_v47, %v1086_v50  ;;  %v1248_v47 = vld [vmem:[#allocation6] sm:$0xff] }
 0x1d4   : > { %1160 = vmatmul.f32.gmra.mxu0 %v1102_v51  ;;  %1283 = vmatpush.msrb.mxu1 %v1248_v47 }
 0x1d6   : > { %v1031_v53 = vpop.f32.mrf.mxu3 }
 0x1d7   : > { %v1032_v54 = vadd.f32 %v1031_v53, %v967_v52 }
 0x1d9   : > { %vm1071_vm5 = vcmp.gt.f32.partialorder %v1032_v54, 0.0  ;;  %v1087_v56 = vmul.f32 0.01, %v1032_v54 }
 0x1db   : > { %v1103_v58 = vsel %vm1071_vm5, %v1032_v54, %v1087_v56 }
 0x1dc   : > { %1163 = vmatmul.f32.gmra.mxu0 %v1103_v58 }
 0x1de   : > { %v1034_v60 = vpop.f32.mrf.mxu3 }
 0x1df   : > { %v1035_v61 = vadd.f32 %v1034_v60, %v970_v59 }
 0x1e1   : > { %vm1072_vm6 = vcmp.gt.f32.partialorder %v1035_v61, 0.0  ;;  %v1088_v1 = vmul.f32 0.01, %v1035_v61 }
 0x1e3   : > { %v1104_v2 = vsel %vm1072_vm6, %v1035_v61, %v1088_v1  ;;  %v1000_v61 = vadd.f32 %v2937_v22, %v2932_v20 }
 0x1e4   : > { %1166 = vmatmul.f32.gmra.mxu0 %v1104_v2 }
 0x1e6   : > { %v1037_v5 = vpop.f32.mrf.mxu3 }
 0x1e7   : > { %v1038_v7 = vadd.f32 %v1037_v5, %v973_v4 }
 0x1e9   : > { %vm1073_vm7 = vcmp.gt.f32.partialorder %v1038_v7, 0.0  ;;  %v1089_v41 = vmul.f32 0.01, %v1038_v7 }
 0x1eb   : > { %v1105_v40 = vsel %vm1073_vm7, %v1038_v7, %v1089_v41 }
 0x1ec   : > { %1169 = vmatmul.f32.gmra.mxu0 %v1105_v40 }
 0x1ee   : > { %v1040_v12 = vpop.f32.mrf.mxu3 }
 0x1ef   : > { %v1041_v13 = vadd.f32 %v1040_v12, %v976_v10 }
 0x1f1   : > { %vm1074_vm8 = vcmp.gt.f32.partialorder %v1041_v13, 0.0  ;;  %v1090_v16 = vmul.f32 0.01, %v1041_v13 }
 0x1f3   : > { %v1106_v17 = vsel %vm1074_vm8, %v1041_v13, %v1090_v16 }
 0x1f4   : > { %1172 = vmatmul.f32.gmra.mxu0 %v1106_v17 }
 0x1f6   : > { %v1043_v19 = vpop.f32.mrf.mxu3 }
 0x1f7   : > { %v1044_v21 = vadd.f32 %v1043_v19, %v979_v18  ;;  %v1394_v18 = vld [vmem:[#allocation7 + $0x68] sm:$0xff] }
 0x1f8   : > { %1403 = vmatpush.msrb.mxu2 %v1394_v18  ;;  %v1542_v18 = vld [vmem:[#allocation9 + $0xe0] sm:$0xff] }
 0x1f9   : > { %vm1075_vm9 = vcmp.gt.f32.partialorder %v1044_v21, 0.0  ;;  %v1091_v23 = vmul.f32 0.01, %v1044_v21 }
 0x1fb   : > { %v1107_v25 = vsel %vm1075_vm9, %v1044_v21, %v1091_v23 }
 0x1fc   : > { %1175 = vmatmul.f32.gmra.mxu0 %v1107_v25  ;;  %v1393_v25 = vld [vmem:[#allocation7 + $0x60] sm:$0xff] }
 0x1fd   : > { %1404 = vmatpush.msrb.mxu2 %v1393_v25 }
 0x1fe   : > { %v1046_v27 = vpop.f32.mrf.mxu3 }
 0x1ff   : > { %v1047_v28 = vadd.f32 %v1046_v27, %v982_v26  ;;  %v1392_v27 = vld [vmem:[#allocation7 + $0x58] sm:$0xff] }
 0x200   : > { %1405 = vmatpush.msrb.mxu2 %v1392_v27 }
 0x201   : > { %vm1076_vm10 = vcmp.gt.f32.partialorder %v1047_v28, 0.0  ;;  %v1092_v29 = vmul.f32 0.01, %v1047_v28 }
 0x202   : > { %1406 = vmatpush.msrb.mxu2 %v1391_v31  ;;  %v2988_v31 = vld [vmem:[#allocation9 + $0xe8] sm:$0xff] }
 0x203   : > { %v1108_v32 = vsel %vm1076_vm10, %v1047_v28, %v1092_v29 }
 0x204   : > { %1178 = vmatmul.f32.gmra.mxu0 %v1108_v32 }
 0x206   : > { %v1049_v34 = vpop.f32.mrf.mxu3 }
 0x207   : > { %v1050_v35 = vadd.f32 %v1049_v34, %v985_v33 }
 0x209   : > { %vm1077_vm11 = vcmp.gt.f32.partialorder %v1050_v35, 0.0  ;;  %v1093_v36 = vmul.f32 0.01, %v1050_v35 }
 0x20b   : > { %v1109_v38 = vsel %vm1077_vm11, %v1050_v35, %v1093_v36  ;;  %v1390_v36 = vld [vmem:[#allocation7 + $0x48] sm:$0xff] }
 0x20c   : > { %1181 = vmatmul.f32.gmra.mxu0 %v1109_v38  ;;  %1407 = vmatpush.msrb.mxu2 %v1390_v36 }
 0x20e   : > { %v1052_v43 = vpop.f32.mrf.mxu3 }
 0x20f   : > { %v1053_v39 = vadd.f32 %v1052_v43, %v988_v42 }
 0x211   : > { %vm1078_vm12 = vcmp.gt.f32.partialorder %v1053_v39, 0.0  ;;  %v1094_v44 = vmul.f32 0.01, %v1053_v39 }
 0x213   : > { %v1110_v46 = vsel %vm1078_vm12, %v1053_v39, %v1094_v44  ;;  %v1389_v39 = vld [vmem:[#allocation7 + $0x40] sm:$0xff]  ;;  %v1388_v44 = vld [vmem:[#allocation7 + $0x38] sm:$0xff] }
 0x214   : > { %1184 = vmatmul.f32.gmra.mxu0 %v1110_v46  ;;  %1408 = vmatpush.msrb.mxu2 %v1389_v39 }
 0x216   : > { %v1055_v49 = vpop.f32.mrf.mxu3  ;;  %1409 = vmatpush.msrb.mxu2 %v1388_v44 }
 0x217   : > { %v1056_v50 = vadd.f32 %v1055_v49, %v991_v48  ;;  %v1387_v49 = vld [vmem:[#allocation7 + $0x30] sm:$0xff] }
 0x218   : > { %1410 = vmatpush.msrb.mxu2 %v1387_v49 }
 0x219   : > { %v1095_v51 = vmul.f32 0.01, %v1056_v50  ;;  %vm1079_vm13 = vcmp.gt.f32.partialorder %v1056_v50, 0.0 }
 0x21b   : > { %v1111_v52 = vsel %vm1079_vm13, %v1056_v50, %v1095_v51 }
 0x21c   : > { %1187 = vmatmul.f32.gmra.mxu0 %v1111_v52 }
 0x21e   : > { %v1058_v53 = vpop.f32.mrf.mxu3 }
 0x21f   : > { %v1059_v54 = vadd.f32 %v1058_v53, %v994_v0  ;;  %v1386_v53 = vld [vmem:[#allocation7 + $0x28] sm:$0xff] }
 0x220   : > { %1411 = vmatpush.msrb.mxu2 %v1386_v53  ;;  %v1530_v53 = vld [vmem:[#allocation9 + $0x80] sm:$0xff] }
 0x221   : > { %v1096_v55 = vmul.f32 0.01, %v1059_v54  ;;  %vm1080_vm14 = vcmp.gt.f32.partialorder %v1059_v54, 0.0 }
 0x223   : > { %v1112_v56 = vsel %vm1080_vm14, %v1059_v54, %v1096_v55  ;;  %v1385_v55 = vld [vmem:[#allocation7 + $0x20] sm:$0xff] }
 0x224   : > { %1190 = vmatmul.f32.gmra.mxu0 %v1112_v56  ;;  %1412 = vmatpush.msrb.mxu2 %v1385_v55 }
 0x226   : > { %v1061_v6 = vpop.f32.mrf.mxu3 }
 0x227   : > { %v1062_v58 = vadd.f32 %v1061_v6, %v997_v57 }
 0x229   : > { %v1097_v59 = vmul.f32 0.01, %v1062_v58  ;;  %vm1081_vm15 = vcmp.gt.f32.partialorder %v1062_v58, 0.0 }
 0x22b   : > { %v1113_v60 = vsel %vm1081_vm15, %v1062_v58, %v1097_v59  ;;  %v1384_v58 = vld [vmem:[#allocation7 + $0x18] sm:$0xff] }
 0x22c   : > { %1193 = vmatmul.f32.gmra.mxu0 %v1113_v60  ;;  %1413 = vmatpush.msrb.mxu2 %v1384_v58  ;;  %v1528_v58 = vld [vmem:[#allocation9 + $0x70] sm:$0xff] }
 0x22e   : > { %v1064_v62 = vpop.f32.mrf.mxu3 }
 0x22f   : > { %v1065_v9 = vadd.f32 %v1064_v62, %v1000_v61 }
 0x231   : > { %v1098_v1 = vmul.f32 0.01, %v1065_v9  ;;  %vm1082_vm0 = vcmp.gt.f32.partialorder %v1065_v9, 0.0 }
 0x233   : > { %v1114_v2 = vsel %vm1082_vm0, %v1065_v9, %v1098_v1  ;;  %v1383_v9 = vld [vmem:[#allocation7 + $0x10] sm:$0xff] }
 0x234   : > { %1196 = vmatmul.f32.gmra.mxu0 %v1114_v2  ;;  %1414 = vmatpush.msrb.mxu2 %v1383_v9  ;;  %v1382_v2 = vld [vmem:[#allocation7 + $0x8] sm:$0xff] }
 0x236   : > { %1415 = vmatpush.msrb.mxu2 %v1382_v2 }
 0x239   : > { %v1152_v4 = vpop.f32.mrf.mxu0 }
 0x23a   : > { %v1153_v15 = vadd.f32 %v2960_v3, %v1152_v4 }
 0x23c   : > { %vm1200_vm1 = vcmp.gt.f32.partialorder %v1153_v15, 0.0  ;;  %v1216_v5 = vmul.f32 0.01, %v1153_v15 }
 0x23e   : > { %v1232_v7 = vsel %vm1200_vm1, %v1153_v15, %v1216_v5 }
 0x23f   : > { %1284 = vmatmul.f32.vlgmr.msrb.gmra.mxu1 %v1232_v7  ;;  %v1381_v7 = vld [vmem:[#allocation7] sm:$0xff] }
 0x240   : > { %1416 = vmatpush.msrb.mxu2 %v1381_v7 }
 0x241   : > { %v1155_v8 = vpop.f32.mrf.mxu0 }
 0x242   : > { %v1156_v41 = vadd.f32 %v2960_v3, %v1155_v8 }
 0x244   : > { %vm1201_vm2 = vcmp.gt.f32.partialorder %v1156_v41, 0.0  ;;  %v1217_v20 = vmul.f32 0.01, %v1156_v41 }
 0x246   : > { %v1233_v22 = vsel %vm1201_vm2, %v1156_v41, %v1217_v20 }
 0x247   : > { %1287 = vmatmul.f32.gmra.mxu1 %v1233_v22 }
 0x249   : > { %v1158_v40 = vpop.f32.mrf.mxu0 }
 0x24a   : > { %v1159_v10 = vadd.f32 %v2960_v3, %v1158_v40 }
 0x24c   : > { %vm1202_vm3 = vcmp.gt.f32.partialorder %v1159_v10, 0.0  ;;  %v1218_v12 = vmul.f32 0.01, %v1159_v10 }
 0x24e   : > { %v1234_v13 = vsel %vm1202_vm3, %v1159_v10, %v1218_v12  ;;  %v1544_v12 = vld [vmem:[#allocation9 + $0xf0] sm:$0xff] }
 0x24f   : > { %1290 = vmatmul.f32.gmra.mxu1 %v1234_v13  ;;  %1552 = vmatpush.msra.mxu3 %v1544_v12 }
 0x251   : > { %v1161_v16 = vpop.f32.mrf.mxu0  ;;  %1553 = vmatpush.msra.mxu3 %v1542_v18  ;;  %v1520_v18 = vld [vmem:[#allocation9 + $0x30] sm:$0xff] }
 0x252   : > { %v1162_v17 = vadd.f32 %v2960_v3, %v1161_v16 }
 0x254   : > { %vm1203_vm4 = vcmp.gt.f32.partialorder %v1162_v17, 0.0  ;;  %v1219_v19 = vmul.f32 0.01, %v1162_v17 }
 0x256   : > { %v1235_v21 = vsel %vm1203_vm4, %v1162_v17, %v1219_v19 }
 0x257   : > { %1293 = vmatmul.f32.gmra.mxu1 %v1235_v21 }
 0x259   : > { %v1164_v63 = vpop.f32.mrf.mxu0 }
 0x25a   : > { %v1165_v23 = vadd.f32 %v2960_v3, %v1164_v63  ;;  %v2981_v63 = vld [vmem:[%s3154_s8] ss:$0 sm:$0xff] }
 0x25c   : > { %vm1204_vm5 = vcmp.gt.f32.partialorder %v1165_v23, 0.0  ;;  %v1220_v24 = vmul.f32 0.01, %v1165_v23 }
 0x25e   : > { %v1236_v26 = vsel %vm1204_vm5, %v1165_v23, %v1220_v24  ;;  %v1540_v23 = vld [vmem:[#allocation9 + $0xd0] sm:$0xff] }
 0x25f   : > { %1296 = vmatmul.f32.gmra.mxu1 %v1236_v26  ;;  %1554 = vmatpush.msra.mxu3 %v1540_v23  ;;  %v2984_v26 = vld [vmem:[#allocation9 + $0xf8] sm:$0xff] }
 0x260   : > { %1617 = vmatpush.msra.mxu0 %v2984_v26 }
 0x261   : > { %v1167_v28 = vpop.f32.mrf.mxu0 }
 0x262   : > { %v1168_v29 = vadd.f32 %v2960_v3, %v1167_v28  ;;  %v1538_v28 = vld [vmem:[#allocation9 + $0xc0] sm:$0xff]  ;;  %1618 = vmatpush.msra.mxu0 %v2988_v31 }
 0x263   : > { %1555 = vmatpush.msra.mxu3 %v1538_v28 }
 0x264   : > { %vm1205_vm6 = vcmp.gt.f32.partialorder %v1168_v29, 0.0  ;;  %v1221_v30 = vmul.f32 0.01, %v1168_v29 }
 0x266   : > { %v1237_v32 = vsel %vm1205_vm6, %v1168_v29, %v1221_v30 }
 0x267   : > { %1299 = vmatmul.f32.gmra.mxu1 %v1237_v32 }
 0x269   : > { %v1170_v33 = vpop.f32.mrf.mxu0 }
 0x26a   : > { %v1171_v34 = vadd.f32 %v2960_v3, %v1170_v33 }
 0x26c   : > { %vm1206_vm7 = vcmp.gt.f32.partialorder %v1171_v34, 0.0  ;;  %v1222_v35 = vmul.f32 0.01, %v1171_v34 }
 0x26e   : > { %v1238_v37 = vsel %vm1206_vm7, %v1171_v34, %v1222_v35  ;;  %v1536_v34 = vld [vmem:[#allocation9 + $0xb0] sm:$0xff] }
 0x26f   : > { %1302 = vmatmul.f32.gmra.mxu1 %v1238_v37  ;;  %1556 = vmatpush.msra.mxu3 %v1536_v34  ;;  %v2992_v37 = vld [vmem:[#allocation9 + $0xd8] sm:$0xff] }
 0x270   : > { %1619 = vmatpush.msra.mxu0 %v2992_v37  ;;  %v1521_v34 = vld [vmem:[#allocation9 + $0x38] sm:$0xff] }
 0x271   : > { %v1173_v38 = vpop.f32.mrf.mxu0 }
 0x272   : > { %v1174_v42 = vadd.f32 %v2960_v3, %v1173_v38 }
 0x274   : > { %vm1207_vm8 = vcmp.gt.f32.partialorder %v1174_v42, 0.0  ;;  %v1223_v43 = vmul.f32 0.01, %v1174_v42 }
 0x276   : > { %v1239_v45 = vsel %vm1207_vm8, %v1174_v42, %v1223_v43  ;;  %v1534_v43 = vld [vmem:[#allocation9 + $0xa0] sm:$0xff] }
 0x277   : > { %1305 = vmatmul.f32.gmra.mxu1 %v1239_v45  ;;  %1557 = vmatpush.msra.mxu3 %v1534_v43  ;;  %v2996_v45 = vld [vmem:[#allocation9 + $0xc8] sm:$0xff] }
 0x278   : > { %1620 = vmatpush.msra.mxu0 %v2996_v45 }
 0x279   : > { %v1176_v46 = vpop.f32.mrf.mxu0 }
 0x27a   : > { %v1177_v47 = vadd.f32 %v2960_v3, %v1176_v46 }
 0x27c   : > { %v1224_v48 = vmul.f32 0.01, %v1177_v47  ;;  %vm1208_vm9 = vcmp.gt.f32.partialorder %v1177_v47, 0.0 }
 0x27e   : > { %v1240_v50 = vsel %vm1208_vm9, %v1177_v47, %v1224_v48  ;;  %v1532_v48 = vld [vmem:[#allocation9 + $0x90] sm:$0xff] }
 0x27f   : > { %1308 = vmatmul.f32.gmra.mxu1 %v1240_v50  ;;  %1558 = vmatpush.msra.mxu3 %v1532_v48  ;;  %v1515_v48 = vld [vmem:[#allocation9 + $0x8] sm:$0xff] }
 0x281   : > { %v1179_v51 = vpop.f32.mrf.mxu0  ;;  %1559 = vmatpush.msra.mxu3 %v1530_v53 }
 0x282   : > { %v1180_v52 = vadd.f32 %v2960_v3, %v1179_v51  ;;  %v3000_v51 = vld [vmem:[#allocation9 + $0xb8] sm:$0xff] }
 0x283   : > { %1621 = vmatpush.msra.mxu0 %v3000_v51  ;;  %1560 = vmatpush.msra.mxu3 %v1528_v58  ;;  %v1808_v58 = vld [vmem:[#allocation10 + $0xf0] sm:$0xff] }
 0x284   : > { %v1225_v0 = vmul.f32 0.01, %v1180_v52  ;;  %vm1209_vm10 = vcmp.gt.f32.partialorder %v1180_v52, 0.0 }
 0x286   : > { %v1241_v54 = vsel %vm1209_vm10, %v1180_v52, %v1225_v0 }
 0x287   : > { %1311 = vmatmul.f32.gmra.mxu1 %v1241_v54 }
 0x289   : > { %v1182_v56 = vpop.f32.mrf.mxu0 }
 0x28a   : > { %v1183_v57 = vadd.f32 %v2960_v3, %v1182_v56  ;;  %v3004_v56 = vld [vmem:[#allocation9 + $0xa8] sm:$0xff] }
 0x28b   : > { %1622 = vmatpush.msra.mxu0 %v3004_v56 }
 0x28c   : > { %v1226_v6 = vmul.f32 0.01, %v1183_v57  ;;  %vm1210_vm11 = vcmp.gt.f32.partialorder %v1183_v57, 0.0 }
 0x28e   : > { %v1242_v59 = vsel %vm1210_vm11, %v1183_v57, %v1226_v6 }
 0x28f   : > { %1314 = vmatmul.f32.gmra.mxu1 %v1242_v59 }
 0x291   : > { %v1185_v60 = vpop.f32.mrf.mxu0 }
 0x292   : > { %v1186_v61 = vadd.f32 %v2960_v3, %v1185_v60 }
 0x294   : > { %v1227_v62 = vmul.f32 0.01, %v1186_v61  ;;  %vm1211_vm12 = vcmp.gt.f32.partialorder %v1186_v61, 0.0 }
 0x296   : > { %v1243_v1 = vsel %vm1211_vm12, %v1186_v61, %v1227_v62  ;;  %v3008_v61 = vld [vmem:[#allocation9 + $0x98] sm:$0xff] }
 0x297   : > { %1317 = vmatmul.f32.gmra.mxu1 %v1243_v1  ;;  %1623 = vmatpush.msra.mxu0 %v3008_v61  ;;  %v1526_v1 = vld [vmem:[#allocation9 + $0x60] sm:$0xff] }
 0x298   : > { %1561 = vmatpush.msra.mxu3 %v1526_v1 }
 0x299   : > { %v1188_v4 = vpop.f32.mrf.mxu0 }
 0x29a   : > { %v1189_v15 = vadd.f32 %v2960_v3, %v1188_v4 }
 0x29c   : > { %v1228_v5 = vmul.f32 0.01, %v1189_v15  ;;  %vm1212_vm13 = vcmp.gt.f32.partialorder %v1189_v15, 0.0 }
 0x29e   : > { %v1244_v8 = vsel %vm1212_vm13, %v1189_v15, %v1228_v5  ;;  %v3012_v15 = vld [vmem:[#allocation9 + $0x88] sm:$0xff] }
 0x29f   : > { %1320 = vmatmul.f32.gmra.mxu1 %v1244_v8  ;;  %1624 = vmatpush.msra.mxu0 %v3012_v15  ;;  %v1524_v8 = vld [vmem:[#allocation9 + $0x50] sm:$0xff] }
 0x2a0   : > { %1562 = vmatpush.msra.mxu3 %v1524_v8 }
 0x2a1   : > { %v1191_v41 = vpop.f32.mrf.mxu0 }
 0x2a2   : > { %v1192_v20 = vadd.f32 %v2960_v3, %v1191_v41 }
 0x2a4   : > { %v1229_v22 = vmul.f32 0.01, %v1192_v20  ;;  %vm1213_vm14 = vcmp.gt.f32.partialorder %v1192_v20, 0.0 }
 0x2a6   : > { %v1245_v40 = vsel %vm1213_vm14, %v1192_v20, %v1229_v22  ;;  %v3016_v22 = vld [vmem:[#allocation9 + $0x78] sm:$0xff] }
 0x2a7   : > { %1323 = vmatmul.f32.gmra.mxu1 %v1245_v40  ;;  %1625 = vmatpush.msra.mxu0 %v3016_v22 }
 0x2a9   : > { %v1194_v10 = vpop.f32.mrf.mxu0 }
 0x2aa   : > { %v1195_v11 = vadd.f32 %v2960_v3, %v1194_v10 }
 0x2ac   : > { %v1230_v13 = vmul.f32 0.01, %v1195_v11  ;;  %vm1214_vm15 = vcmp.gt.f32.partialorder %v1195_v11, 0.0 }
 0x2ae   : > { %v1246_v14 = vsel %vm1214_vm15, %v1195_v11, %v1230_v13  ;;  %v1522_v11 = vld [vmem:[#allocation9 + $0x40] sm:$0xff] }
 0x2af   : > { %1326 = vmatmul.f32.gmra.mxu1 %v1246_v14  ;;  %1563 = vmatpush.msra.mxu3 %v1522_v11 }
 0x2b1   : > { %v1197_v16 = vpop.f32.mrf.mxu0  ;;  %1564 = vmatpush.msra.mxu3 %v1520_v18 }
 0x2b2   : > { %v1198_v17 = vadd.f32 %v2960_v3, %v1197_v16  ;;  %v3020_v16 = vld [vmem:[#allocation9 + $0x68] sm:$0xff] }
 0x2b3   : > { %1626 = vmatpush.msra.mxu0 %v3020_v16 }
 0x2b4   : > { %v1231_v19 = vmul.f32 0.01, %v1198_v17  ;;  %vm1215_vm0 = vcmp.gt.f32.partialorder %v1198_v17, 0.0 }
 0x2b6   : > { %v1247_v21 = vsel %vm1215_vm0, %v1198_v17, %v1231_v19 }
 0x2b7   : > { %1329 = vmatmul.f32.gmra.mxu1 %v1247_v21 }
 0x2bc   : > { %v1285_v24 = vpop.f32.mrf.mxu1 }
 0x2bd   : > { %v1286_v25 = vadd.f32 %v2981_v63, %v1285_v24  ;;  %v1525_v24 = vld [vmem:[#allocation9 + $0x58] sm:$0xff] }
 0x2be   : > { %1627 = vmatpush.msra.mxu0 %v1525_v24 }
 0x2bf   : > { %vm1333_vm1 = vcmp.gt.f32.partialorder %v1286_v25, 0.0  ;;  %v1349_v3 = vmul.f32 0.01, %v1286_v25 }
 0x2c1   : > { %v1365_v27 = vsel %vm1333_vm1, %v1286_v25, %v1349_v3  ;;  %v1518_v3 = vld [vmem:[#allocation9 + $0x20] sm:$0xff] }
 0x2c2   : > { %1417 = vmatmul.f32.vlgmr.msrb.gmra.mxu2 %v1365_v27  ;;  %1565 = vmatpush.msra.mxu3 %v1518_v3 }
 0x2c4   : > { %v1288_v29 = vpop.f32.mrf.mxu1 }
 0x2c5   : > { %v1289_v30 = vadd.f32 %v2981_v63, %v1288_v29 }
 0x2c7   : > { %vm1334_vm2 = vcmp.gt.f32.partialorder %v1289_v30, 0.0  ;;  %v1350_v32 = vmul.f32 0.01, %v1289_v30 }
 0x2c9   : > { %v1366_v33 = vsel %vm1334_vm2, %v1289_v30, %v1350_v32  ;;  %v1523_v30 = vld [vmem:[#allocation9 + $0x48] sm:$0xff] }
 0x2ca   : > { %1420 = vmatmul.f32.gmra.mxu2 %v1366_v33  ;;  %1628 = vmatpush.msra.mxu0 %v1523_v30  ;;  %v1516_v33 = vld [vmem:[#allocation9 + $0x10] sm:$0xff] }
 0x2cb   : > { %1566 = vmatpush.msra.mxu3 %v1516_v33 }
 0x2cc   : > { %v1291_v35 = vpop.f32.mrf.mxu1  ;;  %1629 = vmatpush.msra.mxu0 %v1521_v34 }
 0x2cd   : > { %v1292_v36 = vadd.f32 %v2981_v63, %v1291_v35  ;;  %v1514_v35 = vld [vmem:[#allocation9] sm:$0xff] }
 0x2ce   : > { %1567 = vmatpush.msra.mxu3 %v1514_v35 }
 0x2cf   : > { %vm1335_vm3 = vcmp.gt.f32.partialorder %v1292_v36, 0.0  ;;  %v1351_v38 = vmul.f32 0.01, %v1292_v36 }
 0x2d0   : > { %2147 = vmatpush.msrb.mxu3 %v2984_v26  ;;  %v1517_v26 = vld [vmem:[#allocation9 + $0x18] sm:$0xff] }
 0x2d1   : > { %v1367_v42 = vsel %vm1335_vm3, %v1292_v36, %v1351_v38 }
 0x2d2   : > { %1423 = vmatmul.f32.gmra.mxu2 %v1367_v42  ;;  %2148 = vmatpush.msrb.mxu3 %v2988_v31 }
 0x2d4   : > { %v1294_v39 = vpop.f32.mrf.mxu1  ;;  %2149 = vmatpush.msrb.mxu3 %v2992_v37 }
 0x2d5   : > { %v1295_v44 = vadd.f32 %v2981_v63, %v1294_v39 }
 0x2d6   : > { %2150 = vmatpush.msrb.mxu3 %v2996_v45 }
 0x2d7   : > { %vm1336_vm4 = vcmp.gt.f32.partialorder %v1295_v44, 0.0  ;;  %v1352_v46 = vmul.f32 0.01, %v1295_v44 }
 0x2d8   : > { %2151 = vmatpush.msrb.mxu3 %v3000_v51 }
 0x2d9   : > { %v1368_v47 = vsel %vm1336_vm4, %v1295_v44, %v1352_v46  ;;  %v1519_v46 = vld [vmem:[#allocation9 + $0x28] sm:$0xff] }
 0x2da   : > { %1426 = vmatmul.f32.gmra.mxu2 %v1368_v47  ;;  %1630 = vmatpush.msra.mxu0 %v1519_v46 }
 0x2db   : > { %2152 = vmatpush.msrb.mxu3 %v3004_v56 }
 0x2dc   : > { %v1297_v49 = vpop.f32.mrf.mxu1  ;;  %1631 = vmatpush.msra.mxu0 %v1517_v26 }
 0x2dd   : > { %v1298_v50 = vadd.f32 %v2981_v63, %v1297_v49  ;;  %2153 = vmatpush.msrb.mxu3 %v3008_v61 }
 0x2de   : > { %1632 = vmatpush.msra.mxu0 %v1515_v48 }
 0x2df   : > { %vm1337_vm5 = vcmp.gt.f32.partialorder %v1298_v50, 0.0  ;;  %v1353_v52 = vmul.f32 0.01, %v1298_v50  ;;  %2154 = vmatpush.msrb.mxu3 %v3012_v15 }
 0x2e1   : > { %v1369_v0 = vsel %vm1337_vm5, %v1298_v50, %v1353_v52  ;;  %2155 = vmatpush.msrb.mxu3 %v3016_v22 }
 0x2e2   : > { %1429 = vmatmul.f32.gmra.mxu2 %v1369_v0 }
 0x2e3   : > { %2156 = vmatpush.msrb.mxu3 %v3020_v16 }
 0x2e4   : > { %v1300_v54 = vpop.f32.mrf.mxu1 }
 0x2e5   : > { %v1301_v55 = vadd.f32 %v2981_v63, %v1300_v54  ;;  %2157 = vmatpush.msrb.mxu3 %v1525_v24  ;;  %v3042_v54 = vld [vmem:[%s3156_s10] ss:$0 sm:$0xff] }
 0x2e7   : > { %vm1338_vm6 = vcmp.gt.f32.partialorder %v1301_v55, 0.0  ;;  %v1354_v57 = vmul.f32 0.01, %v1301_v55  ;;  %2158 = vmatpush.msrb.mxu3 %v1523_v30 }
 0x2e9   : > { %v1370_v6 = vsel %vm1338_vm6, %v1301_v55, %v1354_v57  ;;  %2159 = vmatpush.msrb.mxu3 %v1521_v34  ;;  %v1809_v55 = vld [vmem:[#allocation10 + $0xf8] sm:$0xff] }
 0x2ea   : > { %1432 = vmatmul.f32.gmra.mxu2 %v1370_v6 }
 0x2eb   : > { %2160 = vmatpush.msrb.mxu3 %v1519_v46  ;;  %1879 = vmatpush.msra.mxu2 %v1809_v55  ;;  %v1787_v46 = vld [vmem:[#allocation10 + $0x48] sm:$0xff] }
 0x2ec   : > { %v1303_v59 = vpop.f32.mrf.mxu1 }
 0x2ed   : > { %v1304_v60 = vadd.f32 %v2981_v63, %v1303_v59  ;;  %2161 = vmatpush.msrb.mxu3 %v1517_v26  ;;  %1880 = vmatpush.msra.mxu2 %v1808_v58  ;;  %v1800_v26 = vld [vmem:[#allocation10 + $0xb0] sm:$0xff] }
 0x2ee   : > { %v1784_v58 = vld [vmem:[#allocation10 + $0x30] sm:$0xff] }
 0x2ef   : > { %vm1339_vm7 = vcmp.gt.f32.partialorder %v1304_v60, 0.0  ;;  %v1355_v62 = vmul.f32 0.01, %v1304_v60  ;;  %2162 = vmatpush.msrb.mxu3 %v1515_v48 }
 0x2f1   : > { %v1371_v9 = vsel %vm1339_vm7, %v1304_v60, %v1355_v62 }
 0x2f2   : > { %1435 = vmatmul.f32.gmra.mxu2 %v1371_v9  ;;  %v1807_v9 = vld [vmem:[#allocation10 + $0xe8] sm:$0xff] }
 0x2f3   : > { %1881 = vmatpush.msra.mxu2 %v1807_v9 }
 0x2f4   : > { %v1306_v2 = vpop.f32.mrf.mxu1 }
 0x2f5   : > { %v1307_v4 = vadd.f32 %v2981_v63, %v1306_v2 }
 0x2f7   : > { %vm1340_vm8 = vcmp.gt.f32.partialorder %v1307_v4, 0.0  ;;  %v1356_v5 = vmul.f32 0.01, %v1307_v4 }
 0x2f9   : > { %v1372_v7 = vsel %vm1340_vm8, %v1307_v4, %v1356_v5  ;;  %v1793_v4 = vld [vmem:[#allocation10 + $0x78] sm:$0xff] }
 0x2fa   : > { %1438 = vmatmul.f32.gmra.mxu2 %v1372_v7  ;;  %1814 = vmatpush.msra.mxu1 %v1793_v4  ;;  %v1806_v7 = vld [vmem:[#allocation10 + $0xe0] sm:$0xff] }
 0x2fb   : > { %1882 = vmatpush.msra.mxu2 %v1806_v7  ;;  %v1781_v7 = vld [vmem:[#allocation10 + $0x18] sm:$0xff] }
 0x2fc   : > { %v1309_v41 = vpop.f32.mrf.mxu1 }
 0x2fd   : > { %v1310_v20 = vadd.f32 %v2981_v63, %v1309_v41 }
 0x2ff   : > { %vm1341_vm9 = vcmp.gt.f32.partialorder %v1310_v20, 0.0  ;;  %v1357_v40 = vmul.f32 0.01, %v1310_v20 }
 0x301   : > { %v1373_v10 = vsel %vm1341_vm9, %v1310_v20, %v1357_v40  ;;  %v1792_v20 = vld [vmem:[#allocation10 + $0x70] sm:$0xff] }
 0x302   : > { %1441 = vmatmul.f32.gmra.mxu2 %v1373_v10  ;;  %1815 = vmatpush.msra.mxu1 %v1792_v20  ;;  %v1805_v10 = vld [vmem:[#allocation10 + $0xd8] sm:$0xff] }
 0x303   : > { %1883 = vmatpush.msra.mxu2 %v1805_v10  ;;  %v1779_v10 = vld [vmem:[#allocation10 + $0x8] sm:$0xff] }
 0x304   : > { %v1312_v12 = vpop.f32.mrf.mxu1 }
 0x305   : > { %v1313_v13 = vadd.f32 %v2981_v63, %v1312_v12 }
 0x307   : > { %vm1342_vm10 = vcmp.gt.f32.partialorder %v1313_v13, 0.0  ;;  %v1358_v14 = vmul.f32 0.01, %v1313_v13 }
 0x309   : > { %v1374_v17 = vsel %vm1342_vm10, %v1313_v13, %v1358_v14  ;;  %v1791_v14 = vld [vmem:[#allocation10 + $0x68] sm:$0xff] }
 0x30a   : > { %1444 = vmatmul.f32.gmra.mxu2 %v1374_v17  ;;  %1816 = vmatpush.msra.mxu1 %v1791_v14  ;;  %v1804_v17 = vld [vmem:[#allocation10 + $0xd0] sm:$0xff] }
 0x30b   : > { %1884 = vmatpush.msra.mxu2 %v1804_v17 }
 0x30c   : > { %v1315_v19 = vpop.f32.mrf.mxu1 }
 0x30d   : > { %v1316_v21 = vadd.f32 %v2981_v63, %v1315_v19 }
 0x30f   : > { %vm1343_vm11 = vcmp.gt.f32.partialorder %v1316_v21, 0.0  ;;  %v1359_v23 = vmul.f32 0.01, %v1316_v21 }
 0x311   : > { %v1375_v25 = vsel %vm1343_vm11, %v1316_v21, %v1359_v23  ;;  %v1790_v23 = vld [vmem:[#allocation10 + $0x60] sm:$0xff] }
 0x312   : > { %1447 = vmatmul.f32.gmra.mxu2 %v1375_v25  ;;  %1817 = vmatpush.msra.mxu1 %v1790_v23  ;;  %v1803_v25 = vld [vmem:[#allocation10 + $0xc8] sm:$0xff] }
 0x313   : > { %1885 = vmatpush.msra.mxu2 %v1803_v25 }
 0x314   : > { %v1318_v27 = vpop.f32.mrf.mxu1 }
 0x315   : > { %v1319_v28 = vadd.f32 %v2981_v63, %v1318_v27 }
 0x317   : > { %vm1344_vm12 = vcmp.gt.f32.partialorder %v1319_v28, 0.0  ;;  %v1360_v29 = vmul.f32 0.01, %v1319_v28 }
 0x319   : > { %v1376_v32 = vsel %vm1344_vm12, %v1319_v28, %v1360_v29  ;;  %v1789_v29 = vld [vmem:[#allocation10 + $0x58] sm:$0xff] }
 0x31a   : > { %1450 = vmatmul.f32.gmra.mxu2 %v1376_v32  ;;  %1818 = vmatpush.msra.mxu1 %v1789_v29  ;;  %v1802_v32 = vld [vmem:[#allocation10 + $0xc0] sm:$0xff] }
 0x31b   : > { %1886 = vmatpush.msra.mxu2 %v1802_v32 }
 0x31c   : > { %v1321_v36 = vpop.f32.mrf.mxu1 }
 0x31d   : > { %v1322_v38 = vadd.f32 %v2981_v63, %v1321_v36  ;;  %v1788_v36 = vld [vmem:[#allocation10 + $0x50] sm:$0xff] }
 0x31e   : > { %1819 = vmatpush.msra.mxu1 %v1788_v36 }
 0x31f   : > { %vm1345_vm13 = vcmp.gt.f32.partialorder %v1322_v38, 0.0  ;;  %v1361_v42 = vmul.f32 0.01, %v1322_v38 }
 0x320   : > { %1820 = vmatpush.msra.mxu1 %v1787_v46 }
 0x321   : > { %v1377_v43 = vsel %vm1345_vm13, %v1322_v38, %v1361_v42  ;;  %v1801_v42 = vld [vmem:[#allocation10 + $0xb8] sm:$0xff] }
 0x322   : > { %1453 = vmatmul.f32.gmra.mxu2 %v1377_v43 }
 0x323   : > { %1887 = vmatpush.msra.mxu2 %v1801_v42 }
 0x324   : > { %v1324_v39 = vpop.f32.mrf.mxu1 }
 0x325   : > { %v1325_v44 = vadd.f32 %v2981_v63, %v1324_v39  ;;  %1888 = vmatpush.msra.mxu2 %v1800_v26 }
 0x327   : > { %v1362_v47 = vmul.f32 0.01, %v1325_v44  ;;  %vm1346_vm14 = vcmp.gt.f32.partialorder %v1325_v44, 0.0 }
 0x329   : > { %v1378_v31 = vsel %vm1346_vm14, %v1325_v44, %v1362_v47 }
 0x32a   : > { %1456 = vmatmul.f32.gmra.mxu2 %v1378_v31 }
 0x32c   : > { %v1327_v37 = vpop.f32.mrf.mxu1 }
 0x32d   : > { %v1328_v45 = vadd.f32 %v2981_v63, %v1327_v37 }
 0x32f   : > { %v1363_v49 = vmul.f32 0.01, %v1328_v45  ;;  %vm1347_vm15 = vcmp.gt.f32.partialorder %v1328_v45, 0.0 }
 0x331   : > { %v1379_v50 = vsel %vm1347_vm15, %v1328_v45, %v1363_v49  ;;  %v1786_v45 = vld [vmem:[#allocation10 + $0x40] sm:$0xff] }
 0x332   : > { %1459 = vmatmul.f32.gmra.mxu2 %v1379_v50  ;;  %1821 = vmatpush.msra.mxu1 %v1786_v45  ;;  %v1799_v50 = vld [vmem:[#allocation10 + $0xa8] sm:$0xff] }
 0x333   : > { %1889 = vmatpush.msra.mxu2 %v1799_v50 }
 0x334   : > { %v1330_v51 = vpop.f32.mrf.mxu1 }
 0x335   : > { %v1331_v52 = vadd.f32 %v2981_v63, %v1330_v51 }
 0x337   : > { %v1364_v0 = vmul.f32 0.01, %v1331_v52  ;;  %vm1348_vm0 = vcmp.gt.f32.partialorder %v1331_v52, 0.0 }
 0x339   : > { %v1380_v53 = vsel %vm1348_vm0, %v1331_v52, %v1364_v0 }
 0x33a   : > { %1462 = vmatmul.f32.gmra.mxu2 %v1380_v53  ;;  %v1785_v53 = vld [vmem:[#allocation10 + $0x38] sm:$0xff] }
 0x33b   : > { %1822 = vmatpush.msra.mxu1 %v1785_v53 }
 0x33d   : > { %1823 = vmatpush.msra.mxu1 %v1784_v58 }
 0x345   : > { %v1418_v56 = vpop.f32.mrf.mxu2 }
 0x346   : > { %v1419_v57 = vadd.f32 %v3042_v54, %v1418_v56  ;;  %v1798_v56 = vld [vmem:[#allocation10 + $0xa0] sm:$0xff] }
 0x347   : > { %1890 = vmatpush.msra.mxu2 %v1798_v56 }
 0x348   : > { %v1482_v63 = vmul.f32 0.01, %v1419_v57  ;;  %vm1466_vm1 = vcmp.gt.f32.partialorder %v1419_v57, 0.0 }
 0x34a   : > { %v1498_v6 = vsel %vm1466_vm1, %v1419_v57, %v1482_v63 }
 0x34b   : > { %1568 = vmatmul.f32.vlgmr.msra.gmra.mxu3 %v1498_v6  ;;  %1633 = vmatmul.f32.vlgmr.msra.gmra.mxu0 %v1498_v6 }
 0x34c   : > { %2163 = vmatpush.msra.mxu3 %v1793_v4 }
 0x34d   : > { %v1421_v59 = vpop.f32.mrf.mxu2 }
 0x34e   : > { %v1422_v60 = vadd.f32 %v3042_v54, %v1421_v59  ;;  %2164 = vmatpush.msra.mxu3 %v1792_v20 }
 0x350   : > { %vm1467_vm2 = vcmp.gt.f32.partialorder %v1422_v60, 0.0  ;;  %v1483_v61 = vmul.f32 0.01, %v1422_v60  ;;  %2165 = vmatpush.msra.mxu3 %v1791_v14 }
 0x352   : > { %v1499_v62 = vsel %vm1467_vm2, %v1422_v60, %v1483_v61  ;;  %2166 = vmatpush.msra.mxu3 %v1790_v23  ;;  %v1797_v60 = vld [vmem:[#allocation10 + $0x98] sm:$0xff] }
 0x353   : > { %1571 = vmatmul.f32.gmra.mxu3 %v1499_v62  ;;  %1636 = vmatmul.f32.gmra.mxu0 %v1499_v62 }
 0x354   : > { %2167 = vmatpush.msra.mxu3 %v1789_v29  ;;  %1891 = vmatpush.msra.mxu2 %v1797_v60 }
 0x355   : > { %v1424_v1 = vpop.f32.mrf.mxu2 }
 0x356   : > { %v1425_v2 = vadd.f32 %v3042_v54, %v1424_v1  ;;  %2168 = vmatpush.msra.mxu3 %v1788_v36  ;;  %v1783_v1 = vld [vmem:[#allocation10 + $0x28] sm:$0xff] }
 0x357   : > { %1824 = vmatpush.msra.mxu1 %v1783_v1 }
 0x358   : > { %vm1468_vm3 = vcmp.gt.f32.partialorder %v1425_v2, 0.0  ;;  %v1484_v15 = vmul.f32 0.01, %v1425_v2  ;;  %2169 = vmatpush.msra.mxu3 %v1787_v46 }
 0x35a   : > { %v1500_v5 = vsel %vm1468_vm3, %v1425_v2, %v1484_v15  ;;  %2170 = vmatpush.msra.mxu3 %v1786_v45  ;;  %v1796_v2 = vld [vmem:[#allocation10 + $0x90] sm:$0xff]  ;;  %v1782_v15 = vld [vmem:[#allocation10 + $0x20] sm:$0xff] }
 0x35b   : > { %1574 = vmatmul.f32.gmra.mxu3 %v1500_v5  ;;  %1639 = vmatmul.f32.gmra.mxu0 %v1500_v5  ;;  %v1795_v5 = vld [vmem:[#allocation10 + $0x88] sm:$0xff] }
 0x35c   : > { %2171 = vmatpush.msra.mxu3 %v1785_v53  ;;  %1892 = vmatpush.msra.mxu2 %v1796_v2 }
 0x35d   : > { %v1427_v8 = vpop.f32.mrf.mxu2  ;;  %1825 = vmatpush.msra.mxu1 %v1782_v15 }
 0x35e   : > { %v1428_v41 = vadd.f32 %v3042_v54, %v1427_v8  ;;  %2172 = vmatpush.msra.mxu3 %v1784_v58  ;;  %1893 = vmatpush.msra.mxu2 %v1795_v5  ;;  %v1794_v8 = vld [vmem:[#allocation10 + $0x80] sm:$0xff] }
 0x35f   : > { %1826 = vmatpush.msra.mxu1 %v1781_v7 }
 0x360   : > { %vm1469_vm4 = vcmp.gt.f32.partialorder %v1428_v41, 0.0  ;;  %v1485_v22 = vmul.f32 0.01, %v1428_v41  ;;  %2173 = vmatpush.msra.mxu3 %v1783_v1  ;;  %1894 = vmatpush.msra.mxu2 %v1794_v8 }
 0x362   : > { %v1501_v40 = vsel %vm1469_vm4, %v1428_v41, %v1485_v22  ;;  %2174 = vmatpush.msra.mxu3 %v1782_v15  ;;  %v1780_v22 = vld [vmem:[#allocation10 + $0x10] sm:$0xff] }
 0x363   : > { %1577 = vmatmul.f32.gmra.mxu3 %v1501_v40  ;;  %1642 = vmatmul.f32.gmra.mxu0 %v1501_v40 }
 0x364   : > { %2175 = vmatpush.msra.mxu3 %v1781_v7  ;;  %1827 = vmatpush.msra.mxu1 %v1780_v22 }
 0x365   : > { %v1430_v11 = vpop.f32.mrf.mxu2 }
 0x366   : > { %v1431_v12 = vadd.f32 %v3042_v54, %v1430_v11  ;;  %2176 = vmatpush.msra.mxu3 %v1780_v22  ;;  %1828 = vmatpush.msra.mxu1 %v1779_v10 }
 0x368   : > { %vm1470_vm5 = vcmp.gt.f32.partialorder %v1431_v12, 0.0  ;;  %v1486_v13 = vmul.f32 0.01, %v1431_v12  ;;  %2177 = vmatpush.msra.mxu3 %v1779_v10 }
 0x36a   : > { %v1502_v16 = vsel %vm1470_vm5, %v1431_v12, %v1486_v13  ;;  %v1778_v12 = vld [vmem:[#allocation10] sm:$0xff] }
 0x36b   : > { %1580 = vmatmul.f32.gmra.mxu3 %v1502_v16  ;;  %1645 = vmatmul.f32.gmra.mxu0 %v1502_v16 }
 0x36c   : > { %1829 = vmatpush.msra.mxu1 %v1778_v12  ;;  %2178 = vmatpush.msra.mxu3 %v1778_v12 }
 0x36d   : > { %v1433_v18 = vpop.f32.mrf.mxu2 }
 0x36e   : > { %v1434_v19 = vadd.f32 %v3042_v54, %v1433_v18 }
 0x370   : > { %vm1471_vm6 = vcmp.gt.f32.partialorder %v1434_v19, 0.0  ;;  %v1487_v21 = vmul.f32 0.01, %v1434_v19 }
 0x372   : > { %v1503_v24 = vsel %vm1471_vm6, %v1434_v19, %v1487_v21 }
 0x373   : > { %1583 = vmatmul.f32.gmra.mxu3 %v1503_v24  ;;  %1648 = vmatmul.f32.gmra.mxu0 %v1503_v24  ;;  %v1546_v24 = vld [vmem:[%s3158_s12] sm:$0x3] }
 0x374   : > { %v3063_v25 = vperm.slane %v1546_v24, 1  ;;  %v3066_v29 = vperm.slane %v1546_v24, 0 }
 0x375   : > { %v1436_v3 = vpop.f32.mrf.mxu2 }
 0x376   : > { %v1437_v27 = vadd.f32 %v3042_v54, %v1436_v3 }
 0x378   : > { %vm1472_vm7 = vcmp.gt.f32.partialorder %v1437_v27, 0.0  ;;  %v1488_v28 = vmul.f32 0.01, %v1437_v27 }
 0x37a   : > { %v1504_v30 = vsel %vm1472_vm7, %v1437_v27, %v1488_v28 }
 0x37b   : > { %1586 = vmatmul.f32.gmra.mxu3 %v1504_v30  ;;  %1651 = vmatmul.f32.gmra.mxu0 %v1504_v30 }
 0x37d   : > { %v1439_v33 = vpop.f32.mrf.mxu2 }
 0x37e   : > { %v1440_v34 = vadd.f32 %v3042_v54, %v1439_v33 }
 0x380   : > { %vm1473_vm8 = vcmp.gt.f32.partialorder %v1440_v34, 0.0  ;;  %v1489_v35 = vmul.f32 0.01, %v1440_v34 }
 0x382   : > { %v1505_v38 = vsel %vm1473_vm8, %v1440_v34, %v1489_v35 }
 0x383   : > { %1589 = vmatmul.f32.gmra.mxu3 %v1505_v38  ;;  %1654 = vmatmul.f32.gmra.mxu0 %v1505_v38 }
 0x385   : > { %v1442_v43 = vpop.f32.mrf.mxu2 }
 0x386   : > { %v1443_v39 = vadd.f32 %v3042_v54, %v1442_v43 }
 0x388   : > { %v1490_v44 = vmul.f32 0.01, %v1443_v39  ;;  %vm1474_vm9 = vcmp.gt.f32.partialorder %v1443_v39, 0.0 }
 0x38a   : > { %v1506_v47 = vsel %vm1474_vm9, %v1443_v39, %v1490_v44 }
 0x38b   : > { %1592 = vmatmul.f32.gmra.mxu3 %v1506_v47  ;;  %1657 = vmatmul.f32.gmra.mxu0 %v1506_v47 }
 0x38d   : > { %v1445_v48 = vpop.f32.mrf.mxu2 }
 0x38e   : > { %v1446_v31 = vadd.f32 %v3042_v54, %v1445_v48 }
 0x390   : > { %v1491_v37 = vmul.f32 0.01, %v1446_v31  ;;  %vm1475_vm10 = vcmp.gt.f32.partialorder %v1446_v31, 0.0 }
 0x392   : > { %v1507_v49 = vsel %vm1475_vm10, %v1446_v31, %v1491_v37 }
 0x393   : > { %1595 = vmatmul.f32.gmra.mxu3 %v1507_v49  ;;  %1660 = vmatmul.f32.gmra.mxu0 %v1507_v49 }
 0x395   : > { %v1448_v51 = vpop.f32.mrf.mxu2 }
 0x396   : > { %v1449_v52 = vadd.f32 %v3042_v54, %v1448_v51 }
 0x398   : > { %v1492_v0 = vmul.f32 0.01, %v1449_v52  ;;  %vm1476_vm11 = vcmp.gt.f32.partialorder %v1449_v52, 0.0 }
 0x39a   : > { %v1508_v55 = vsel %vm1476_vm11, %v1449_v52, %v1492_v0 }
 0x39b   : > { %1598 = vmatmul.f32.gmra.mxu3 %v1508_v55  ;;  %1663 = vmatmul.f32.gmra.mxu0 %v1508_v55 }
 0x39d   : > { %v1451_v57 = vpop.f32.mrf.mxu2 }
 0x39e   : > { %v1452_v63 = vadd.f32 %v3042_v54, %v1451_v57 }
 0x3a0   : > { %v1493_v6 = vmul.f32 0.01, %v1452_v63  ;;  %vm1477_vm12 = vcmp.gt.f32.partialorder %v1452_v63, 0.0 }
 0x3a2   : > { %v1509_v59 = vsel %vm1477_vm12, %v1452_v63, %v1493_v6 }
 0x3a3   : > { %1601 = vmatmul.f32.gmra.mxu3 %v1509_v59  ;;  %1666 = vmatmul.f32.gmra.mxu0 %v1509_v59 }
 0x3a5   : > { %v1454_v61 = vpop.f32.mrf.mxu2 }
 0x3a6   : > { %v1455_v62 = vadd.f32 %v3042_v54, %v1454_v61 }
 0x3a8   : > { %v1494_v9 = vmul.f32 0.01, %v1455_v62  ;;  %vm1478_vm13 = vcmp.gt.f32.partialorder %v1455_v62, 0.0 }
 0x3aa   : > { %v1510_v4 = vsel %vm1478_vm13, %v1455_v62, %v1494_v9 }
 0x3ab   : > { %1604 = vmatmul.f32.gmra.mxu3 %v1510_v4  ;;  %1669 = vmatmul.f32.gmra.mxu0 %v1510_v4 }
 0x3ad   : > { %v1457_v41 = vpop.f32.mrf.mxu2 }
 0x3ae   : > { %v1458_v20 = vadd.f32 %v3042_v54, %v1457_v41 }
 0x3b0   : > { %v1495_v40 = vmul.f32 0.01, %v1458_v20  ;;  %vm1479_vm14 = vcmp.gt.f32.partialorder %v1458_v20, 0.0 }
 0x3b2   : > { %v1511_v11 = vsel %vm1479_vm14, %v1458_v20, %v1495_v40 }
 0x3b3   : > { %1607 = vmatmul.f32.gmra.mxu3 %v1511_v11  ;;  %1672 = vmatmul.f32.gmra.mxu0 %v1511_v11 }
 0x3b5   : > { %v1460_v13 = vpop.f32.mrf.mxu2 }
 0x3b6   : > { %v1461_v14 = vadd.f32 %v3042_v54, %v1460_v13 }
 0x3b8   : > { %v1496_v16 = vmul.f32 0.01, %v1461_v14  ;;  %vm1480_vm15 = vcmp.gt.f32.partialorder %v1461_v14, 0.0 }
 0x3ba   : > { %v1512_v17 = vsel %vm1480_vm15, %v1461_v14, %v1496_v16 }
 0x3bb   : > { %1610 = vmatmul.f32.gmra.mxu3 %v1512_v17 }
 0x3bd   : > { %v1463_v18 = vpop.f32.mrf.mxu2 }
 0x3be   : > { %v1464_v19 = vadd.f32 %v3042_v54, %v1463_v18 }
 0x3c0   : > { %v1497_v21 = vmul.f32 0.01, %v1464_v19  ;;  %vm1481_vm0 = vcmp.gt.f32.partialorder %v1464_v19, 0.0 }
 0x3c2   : > { %v1513_v23 = vsel %vm1481_vm0, %v1464_v19, %v1497_v21 }
 0x3c3   : > { %1613 = vmatmul.f32.gmra.mxu3 %v1513_v23 }
 0x3c8   : > { %v1634_v3 = vpop.f32.mrf.mxu0 }
 0x3c9   : > { %v1635_v27 = vadd.f32 %v1634_v3, %v3063_v25 }
 0x3cb   : > { %vm1683_vm1 = vcmp.gt.f32.partialorder %v1635_v27, 0.0  ;;  %v1715_v28 = vmul.f32 0.01, %v1635_v27  ;;  %1675 = vmatmul.f32.vlgmr.msrb.gmra.mxu3 %v1512_v17 }
 0x3cd   : > { %v1747_v30 = vsel %vm1683_vm1, %v1635_v27, %v1715_v28 }
 0x3ce   : > { %v1569_v54 = vpop.f32.mrf.mxu3  ;;  %1895 = vmatmul.f32.vlgmr.msra.gmra.mxu2 %v1747_v30 }
 0x3cf   : > { %v1570_v32 = vadd.f32 %v1569_v54, %v3066_v29 }
 0x3d0   : > { %v1637_v33 = vpop.f32.mrf.mxu0 }
 0x3d1   : > { %vm1682_vm2 = vcmp.gt.f32.partialorder %v1570_v32, 0.0  ;;  %v1714_v34 = vmul.f32 0.01, %v1570_v32  ;;  %v1638_v35 = vadd.f32 %v1637_v33, %v3063_v25 }
 0x3d3   : > { %v1746_v36 = vsel %vm1682_vm2, %v1570_v32, %v1714_v34  ;;  %v1717_v38 = vmul.f32 0.01, %v1638_v35  ;;  %1678 = vmatmul.f32.gmra.mxu3 %v1513_v23  ;;  %vm1685_vm3 = vcmp.gt.f32.partialorder %v1638_v35, 0.0 }
 0x3d4   : > { %1830 = vmatmul.f32.vlgmr.msra.gmra.mxu1 %v1746_v36 }
 0x3d5   : > { %v1749_v42 = vsel %vm1685_vm3, %v1638_v35, %v1717_v38 }
 0x3d6   : > { %v1572_v43 = vpop.f32.mrf.mxu3  ;;  %1898 = vmatmul.f32.gmra.mxu2 %v1749_v42 }
 0x3d7   : > { %v1573_v39 = vadd.f32 %v1572_v43, %v3066_v29 }
 0x3d8   : > { %v1640_v44 = vpop.f32.mrf.mxu0 }
 0x3d9   : > { %v1716_v46 = vmul.f32 0.01, %v1573_v39  ;;  %v1641_v47 = vadd.f32 %v1640_v44, %v3063_v25  ;;  %vm1684_vm4 = vcmp.gt.f32.partialorder %v1573_v39, 0.0 }
 0x3db   : > { %v1719_v26 = vmul.f32 0.01, %v1641_v47  ;;  %v1748_v48 = vsel %vm1684_vm4, %v1573_v39, %v1716_v46  ;;  %vm1687_vm5 = vcmp.gt.f32.partialorder %v1641_v47, 0.0 }
 0x3dc   : > { %1833 = vmatmul.f32.gmra.mxu1 %v1748_v48 }
 0x3dd   : > { %v1751_v31 = vsel %vm1687_vm5, %v1641_v47, %v1719_v26 }
 0x3de   : > { %v1575_v37 = vpop.f32.mrf.mxu3  ;;  %1901 = vmatmul.f32.gmra.mxu2 %v1751_v31 }
 0x3df   : > { %v1576_v45 = vadd.f32 %v1575_v37, %v3066_v29 }
 0x3e0   : > { %v1643_v49 = vpop.f32.mrf.mxu0 }
 0x3e1   : > { %v1718_v50 = vmul.f32 0.01, %v1576_v45  ;;  %v1644_v51 = vadd.f32 %v1643_v49, %v3063_v25  ;;  %vm1686_vm6 = vcmp.gt.f32.partialorder %v1576_v45, 0.0 }
 0x3e3   : > { %v1721_v52 = vmul.f32 0.01, %v1644_v51  ;;  %v1750_v0 = vsel %vm1686_vm6, %v1576_v45, %v1718_v50  ;;  %vm1689_vm7 = vcmp.gt.f32.partialorder %v1644_v51, 0.0 }
 0x3e4   : > { %1836 = vmatmul.f32.gmra.mxu1 %v1750_v0 }
 0x3e5   : > { %v1753_v53 = vsel %vm1689_vm7, %v1644_v51, %v1721_v52 }
 0x3e6   : > { %v1578_v55 = vpop.f32.mrf.mxu3  ;;  %1904 = vmatmul.f32.gmra.mxu2 %v1753_v53 }
 0x3e7   : > { %v1579_v56 = vadd.f32 %v1578_v55, %v3066_v29 }
 0x3e8   : > { %v1646_v57 = vpop.f32.mrf.mxu0 }
 0x3e9   : > { %v1720_v63 = vmul.f32 0.01, %v1579_v56  ;;  %v1647_v6 = vadd.f32 %v1646_v57, %v3063_v25  ;;  %vm1688_vm8 = vcmp.gt.f32.partialorder %v1579_v56, 0.0 }
 0x3eb   : > { %v1723_v58 = vmul.f32 0.01, %v1647_v6  ;;  %v1752_v59 = vsel %vm1688_vm8, %v1579_v56, %v1720_v63  ;;  %vm1691_vm9 = vcmp.gt.f32.partialorder %v1647_v6, 0.0 }
 0x3ec   : > { %1839 = vmatmul.f32.gmra.mxu1 %v1752_v59 }
 0x3ed   : > { %v1755_v60 = vsel %vm1691_vm9, %v1647_v6, %v1723_v58 }
 0x3ee   : > { %v1581_v61 = vpop.f32.mrf.mxu3  ;;  %1907 = vmatmul.f32.gmra.mxu2 %v1755_v60 }
 0x3ef   : > { %v1582_v62 = vadd.f32 %v1581_v61, %v3066_v29 }
 0x3f0   : > { %v1649_v9 = vpop.f32.mrf.mxu0 }
 0x3f1   : > { %v1722_v1 = vmul.f32 0.01, %v1582_v62  ;;  %v1650_v2 = vadd.f32 %v1649_v9, %v3063_v25  ;;  %vm1690_vm10 = vcmp.gt.f32.partialorder %v1582_v62, 0.0 }
 0x3f3   : > { %v1725_v4 = vmul.f32 0.01, %v1650_v2  ;;  %v1754_v15 = vsel %vm1690_vm10, %v1582_v62, %v1722_v1  ;;  %vm1693_vm11 = vcmp.gt.f32.partialorder %v1650_v2, 0.0 }
 0x3f4   : > { %1842 = vmatmul.f32.gmra.mxu1 %v1754_v15 }
 0x3f5   : > { %v1757_v5 = vsel %vm1693_vm11, %v1650_v2, %v1725_v4 }
 0x3f6   : > { %v1584_v7 = vpop.f32.mrf.mxu3  ;;  %1910 = vmatmul.f32.gmra.mxu2 %v1757_v5 }
 0x3f7   : > { %v1585_v8 = vadd.f32 %v1584_v7, %v3066_v29 }
 0x3f8   : > { %v1652_v41 = vpop.f32.mrf.mxu0 }
 0x3f9   : > { %v1724_v20 = vmul.f32 0.01, %v1585_v8  ;;  %v1653_v22 = vadd.f32 %v1652_v41, %v3063_v25  ;;  %vm1692_vm12 = vcmp.gt.f32.partialorder %v1585_v8, 0.0 }
 0x3fb   : > { %v1727_v40 = vmul.f32 0.01, %v1653_v22  ;;  %v1756_v10 = vsel %vm1692_vm12, %v1585_v8, %v1724_v20  ;;  %vm1695_vm13 = vcmp.gt.f32.partialorder %v1653_v22, 0.0 }
 0x3fc   : > { %1845 = vmatmul.f32.gmra.mxu1 %v1756_v10 }
 0x3fd   : > { %v1759_v11 = vsel %vm1695_vm13, %v1653_v22, %v1727_v40 }
 0x3fe   : > { %v1587_v12 = vpop.f32.mrf.mxu3  ;;  %1913 = vmatmul.f32.gmra.mxu2 %v1759_v11 }
 0x3ff   : > { %v1588_v13 = vadd.f32 %v1587_v12, %v3066_v29 }
 0x400   : > { %v1655_v14 = vpop.f32.mrf.mxu0 }
 0x401   : > { %v1726_v16 = vmul.f32 0.01, %v1588_v13  ;;  %v1656_v17 = vadd.f32 %v1655_v14, %v3063_v25  ;;  %vm1694_vm14 = vcmp.gt.f32.partialorder %v1588_v13, 0.0 }
 0x403   : > { %v1729_v18 = vmul.f32 0.01, %v1656_v17  ;;  %v1758_v19 = vsel %vm1694_vm14, %v1588_v13, %v1726_v16  ;;  %vm1697_vm15 = vcmp.gt.f32.partialorder %v1656_v17, 0.0 }
 0x404   : > { %1848 = vmatmul.f32.gmra.mxu1 %v1758_v19 }
 0x405   : > { %v1761_v21 = vsel %vm1697_vm15, %v1656_v17, %v1729_v18 }
 0x406   : > { %v1590_v23 = vpop.f32.mrf.mxu3  ;;  %1916 = vmatmul.f32.gmra.mxu2 %v1761_v21  ;;  %v3100_v21 = vld [vmem:[%s3160_s14] ss:$0 sm:$0xff] }
 0x407   : > { %v1591_v24 = vadd.f32 %v1590_v23, %v3066_v29 }
 0x408   : > { %v1658_v3 = vpop.f32.mrf.mxu0 }
 0x409   : > { %v1728_v27 = vmul.f32 0.01, %v1591_v24  ;;  %v1659_v28 = vadd.f32 %v1658_v3, %v3063_v25  ;;  %vm1696_vm0 = vcmp.gt.f32.partialorder %v1591_v24, 0.0 }
 0x40b   : > { %v1731_v30 = vmul.f32 0.01, %v1659_v28  ;;  %v1760_v54 = vsel %vm1696_vm0, %v1591_v24, %v1728_v27  ;;  %vm1699_vm1 = vcmp.gt.f32.partialorder %v1659_v28, 0.0 }
 0x40c   : > { %1851 = vmatmul.f32.gmra.mxu1 %v1760_v54 }
 0x40d   : > { %v1763_v32 = vsel %vm1699_vm1, %v1659_v28, %v1731_v30 }
 0x40e   : > { %v1593_v33 = vpop.f32.mrf.mxu3  ;;  %1919 = vmatmul.f32.gmra.mxu2 %v1763_v32 }
 0x40f   : > { %v1594_v34 = vadd.f32 %v1593_v33, %v3066_v29 }
 0x410   : > { %v1661_v35 = vpop.f32.mrf.mxu0 }
 0x411   : > { %v1730_v36 = vmul.f32 0.01, %v1594_v34  ;;  %v1662_v38 = vadd.f32 %v1661_v35, %v3063_v25  ;;  %vm1698_vm2 = vcmp.gt.f32.partialorder %v1594_v34, 0.0 }
 0x413   : > { %v1733_v42 = vmul.f32 0.01, %v1662_v38  ;;  %v1762_v43 = vsel %vm1698_vm2, %v1594_v34, %v1730_v36  ;;  %vm1701_vm3 = vcmp.gt.f32.partialorder %v1662_v38, 0.0 }
 0x414   : > { %1854 = vmatmul.f32.gmra.mxu1 %v1762_v43 }
 0x415   : > { %v1765_v39 = vsel %vm1701_vm3, %v1662_v38, %v1733_v42 }
 0x416   : > { %v1596_v44 = vpop.f32.mrf.mxu3  ;;  %1922 = vmatmul.f32.gmra.mxu2 %v1765_v39 }
 0x417   : > { %v1597_v46 = vadd.f32 %v1596_v44, %v3066_v29 }
 0x418   : > { %v1664_v47 = vpop.f32.mrf.mxu0 }
 0x419   : > { %v1732_v26 = vmul.f32 0.01, %v1597_v46  ;;  %v1665_v48 = vadd.f32 %v1664_v47, %v3063_v25  ;;  %vm1700_vm4 = vcmp.gt.f32.partialorder %v1597_v46, 0.0 }
 0x41b   : > { %v1735_v31 = vmul.f32 0.01, %v1665_v48  ;;  %v1764_v37 = vsel %vm1700_vm4, %v1597_v46, %v1732_v26  ;;  %vm1703_vm5 = vcmp.gt.f32.partialorder %v1665_v48, 0.0 }
 0x41c   : > { %1857 = vmatmul.f32.gmra.mxu1 %v1764_v37 }
 0x41d   : > { %v1767_v45 = vsel %vm1703_vm5, %v1665_v48, %v1735_v31 }
 0x41e   : > { %v1599_v49 = vpop.f32.mrf.mxu3  ;;  %1925 = vmatmul.f32.gmra.mxu2 %v1767_v45 }
 0x41f   : > { %v1600_v50 = vadd.f32 %v1599_v49, %v3066_v29 }
 0x420   : > { %v1667_v51 = vpop.f32.mrf.mxu0 }
 0x421   : > { %v1734_v52 = vmul.f32 0.01, %v1600_v50  ;;  %v1668_v0 = vadd.f32 %v1667_v51, %v3063_v25  ;;  %vm1702_vm6 = vcmp.gt.f32.partialorder %v1600_v50, 0.0 }
 0x423   : > { %v1737_v53 = vmul.f32 0.01, %v1668_v0  ;;  %v1766_v55 = vsel %vm1702_vm6, %v1600_v50, %v1734_v52  ;;  %vm1705_vm7 = vcmp.gt.f32.partialorder %v1668_v0, 0.0 }
 0x424   : > { %1860 = vmatmul.f32.gmra.mxu1 %v1766_v55 }
 0x425   : > { %v1769_v56 = vsel %vm1705_vm7, %v1668_v0, %v1737_v53 }
 0x426   : > { %v1602_v57 = vpop.f32.mrf.mxu3  ;;  %1928 = vmatmul.f32.gmra.mxu2 %v1769_v56 }
 0x427   : > { %v1603_v63 = vadd.f32 %v1602_v57, %v3066_v29 }
 0x428   : > { %v1670_v6 = vpop.f32.mrf.mxu0 }
 0x429   : > { %v1736_v58 = vmul.f32 0.01, %v1603_v63  ;;  %v1671_v59 = vadd.f32 %v1670_v6, %v3063_v25  ;;  %vm1704_vm8 = vcmp.gt.f32.partialorder %v1603_v63, 0.0 }
 0x42b   : > { %v1739_v60 = vmul.f32 0.01, %v1671_v59  ;;  %v1768_v61 = vsel %vm1704_vm8, %v1603_v63, %v1736_v58  ;;  %vm1707_vm9 = vcmp.gt.f32.partialorder %v1671_v59, 0.0 }
 0x42c   : > { %1863 = vmatmul.f32.gmra.mxu1 %v1768_v61 }
 0x42d   : > { %v1771_v62 = vsel %vm1707_vm9, %v1671_v59, %v1739_v60 }
 0x42e   : > { %v1605_v9 = vpop.f32.mrf.mxu3  ;;  %1931 = vmatmul.f32.gmra.mxu2 %v1771_v62 }
 0x42f   : > { %v1606_v1 = vadd.f32 %v1605_v9, %v3066_v29 }
 0x430   : > { %v1673_v2 = vpop.f32.mrf.mxu0 }
 0x431   : > { %v1738_v4 = vmul.f32 0.01, %v1606_v1  ;;  %v1674_v15 = vadd.f32 %v1673_v2, %v3063_v25  ;;  %vm1706_vm10 = vcmp.gt.f32.partialorder %v1606_v1, 0.0 }
 0x433   : > { %v1741_v5 = vmul.f32 0.01, %v1674_v15  ;;  %v1770_v7 = vsel %vm1706_vm10, %v1606_v1, %v1738_v4  ;;  %vm1709_vm11 = vcmp.gt.f32.partialorder %v1674_v15, 0.0 }
 0x434   : > { %1866 = vmatmul.f32.gmra.mxu1 %v1770_v7 }
 0x435   : > { %v1773_v8 = vsel %vm1709_vm11, %v1674_v15, %v1741_v5 }
 0x436   : > { %v1608_v41 = vpop.f32.mrf.mxu3  ;;  %1934 = vmatmul.f32.gmra.mxu2 %v1773_v8 }
 0x437   : > { %v1609_v20 = vadd.f32 %v1608_v41, %v3066_v29 }
 0x439   : > { %v1740_v22 = vmul.f32 0.01, %v1609_v20  ;;  %vm1708_vm12 = vcmp.gt.f32.partialorder %v1609_v20, 0.0 }
 0x43b   : > { %v1772_v40 = vsel %vm1708_vm12, %v1609_v20, %v1740_v22 }
 0x43c   : > { %1869 = vmatmul.f32.gmra.mxu1 %v1772_v40 }
 0x43e   : > { %v1611_v10 = vpop.f32.mrf.mxu3 }
 0x43f   : > { %v1612_v11 = vadd.f32 %v1611_v10, %v3066_v29 }
 0x441   : > { %vm1710_vm13 = vcmp.gt.f32.partialorder %v1612_v11, 0.0  ;;  %v1742_v12 = vmul.f32 0.01, %v1612_v11 }
 0x443   : > { %v1774_v13 = vsel %vm1710_vm13, %v1612_v11, %v1742_v12 }
 0x444   : > { %1872 = vmatmul.f32.vlgmr.msra.gmra.mxu3 %v1774_v13 }
 0x446   : > { %v1614_v14 = vpop.f32.mrf.mxu3 }
 0x447   : > { %v1615_v16 = vadd.f32 %v1614_v14, %v3066_v29 }
 0x449   : > { %v1744_v17 = vmul.f32 0.01, %v1615_v16  ;;  %vm1712_vm14 = vcmp.gt.f32.partialorder %v1615_v16, 0.0 }
 0x44b   : > { %v1776_v18 = vsel %vm1712_vm14, %v1615_v16, %v1744_v17 }
 0x44c   : > { %1875 = vmatmul.f32.gmra.mxu3 %v1776_v18 }
 0x44e   : > { %v1676_v19 = vpop.f32.mrf.mxu3 }
 0x44f   : > { %v1677_v23 = vadd.f32 %v1676_v19, %v3063_v25 }
 0x451   : > { %v1743_v24 = vmul.f32 0.01, %v1677_v23  ;;  %v1831_v3 = vpop.f32.mrf.mxu1  ;;  %v1896_v27 = vpop.f32.mrf.mxu2  ;;  %vm1711_vm15 = vcmp.gt.f32.partialorder %v1677_v23, 0.0 }
 0x452   : > { %v1832_v28 = vadd.f32 %v3100_v21, %v1831_v3 }
 0x453   : > { %v1775_v29 = vsel %vm1711_vm15, %v1677_v23, %v1743_v24 }
 0x454   : > { %v1897_v30 = vadd.f32 %v1896_v27, %v1832_v28  ;;  %1937 = vmatmul.f32.gmra.mxu2 %v1775_v29 }
 0x456   : > { %1944 = vst [vmem:[%s3109_s25] sm:$0xff] %v1897_v30  ;;  %v1679_v54 = vpop.f32.mrf.mxu3 }
 0x457   : > { %v1680_v32 = vadd.f32 %v1679_v54, %v3063_v25 }
 0x459   : > { %v1745_v33 = vmul.f32 0.01, %v1680_v32  ;;  %v1834_v34 = vpop.f32.mrf.mxu1  ;;  %v1899_v35 = vpop.f32.mrf.mxu2  ;;  %vm1713_vm0 = vcmp.gt.f32.partialorder %v1680_v32, 0.0 }
 0x45a   : > { %v1835_v36 = vadd.f32 %v3100_v21, %v1834_v34 }
 0x45b   : > { %v1777_v38 = vsel %vm1713_vm0, %v1680_v32, %v1745_v33 }
 0x45c   : > { %v1900_v42 = vadd.f32 %v1899_v35, %v1835_v36  ;;  %1940 = vmatmul.f32.gmra.mxu2 %v1777_v38 }
 0x45e   : > { %1945 = vst [vmem:[%s3109_s25 + $0x8] sm:$0xff] %v1900_v42 }
 0x461   : > { %v1837_v43 = vpop.f32.mrf.mxu1  ;;  %v1902_v39 = vpop.f32.mrf.mxu2 }
 0x462   : > { %v1838_v44 = vadd.f32 %v3100_v21, %v1837_v43 }
 0x464   : > { %v1903_v46 = vadd.f32 %v1902_v39, %v1838_v44 }
 0x466   : > { %1946 = vst [vmem:[%s3109_s25 + $0x10] sm:$0xff] %v1903_v46 }
 0x469   : > { %v1840_v25 = vpop.f32.mrf.mxu1  ;;  %v1905_v47 = vpop.f32.mrf.mxu2 }
 0x46a   : > { %v1841_v26 = vadd.f32 %v3100_v21, %v1840_v25 }
 0x46c   : > { %v1906_v48 = vadd.f32 %v1905_v47, %v1841_v26 }
 0x46e   : > { %1947 = vst [vmem:[%s3109_s25 + $0x18] sm:$0xff] %v1906_v48 }
 0x471   : > { %v1843_v31 = vpop.f32.mrf.mxu1  ;;  %v1908_v37 = vpop.f32.mrf.mxu2 }
 0x472   : > { %v1844_v45 = vadd.f32 %v3100_v21, %v1843_v31 }
 0x474   : > { %v1909_v49 = vadd.f32 %v1908_v37, %v1844_v45 }
 0x476   : > { %1948 = vst [vmem:[%s3109_s25 + $0x20] sm:$0xff] %v1909_v49 }
 0x479   : > { %v1846_v50 = vpop.f32.mrf.mxu1  ;;  %v1911_v51 = vpop.f32.mrf.mxu2 }
 0x47a   : > { %v1847_v52 = vadd.f32 %v3100_v21, %v1846_v50 }
 0x47c   : > { %v1912_v0 = vadd.f32 %v1911_v51, %v1847_v52 }
 0x47e   : > { %1949 = vst [vmem:[%s3109_s25 + $0x28] sm:$0xff] %v1912_v0 }
 0x481   : > { %v1849_v53 = vpop.f32.mrf.mxu1  ;;  %v1914_v55 = vpop.f32.mrf.mxu2 }
 0x482   : > { %v1850_v56 = vadd.f32 %v3100_v21, %v1849_v53 }
 0x484   : > { %v1915_v57 = vadd.f32 %v1914_v55, %v1850_v56 }
 0x486   : > { %1950 = vst [vmem:[%s3109_s25 + $0x30] sm:$0xff] %v1915_v57 }
 0x489   : > { %v1852_v63 = vpop.f32.mrf.mxu1  ;;  %v1917_v6 = vpop.f32.mrf.mxu2 }
 0x48a   : > { %v1853_v58 = vadd.f32 %v3100_v21, %v1852_v63 }
 0x48c   : > { %v1918_v59 = vadd.f32 %v1917_v6, %v1853_v58 }
 0x48e   : > { %1951 = vst [vmem:[%s3109_s25 + $0x38] sm:$0xff] %v1918_v59 }
 0x491   : > { %v1855_v60 = vpop.f32.mrf.mxu1  ;;  %v1920_v61 = vpop.f32.mrf.mxu2 }
 0x492   : > { %v1856_v62 = vadd.f32 %v3100_v21, %v1855_v60 }
 0x494   : > { %v1921_v9 = vadd.f32 %v1920_v61, %v1856_v62 }
 0x496   : > { %1952 = vst [vmem:[%s3109_s25 + $0x40] sm:$0xff] %v1921_v9 }
 0x499   : > { %v1858_v1 = vpop.f32.mrf.mxu1  ;;  %v1923_v2 = vpop.f32.mrf.mxu2 }
 0x49a   : > { %v1859_v4 = vadd.f32 %v3100_v21, %v1858_v1 }
 0x49c   : > { %v1924_v15 = vadd.f32 %v1923_v2, %v1859_v4 }
 0x49e   : > { %1953 = vst [vmem:[%s3109_s25 + $0x48] sm:$0xff] %v1924_v15 }
 0x4a1   : > { %v1861_v5 = vpop.f32.mrf.mxu1  ;;  %v1926_v7 = vpop.f32.mrf.mxu2 }
 0x4a2   : > { %v1862_v8 = vadd.f32 %v3100_v21, %v1861_v5 }
 0x4a4   : > { %v1927_v41 = vadd.f32 %v1926_v7, %v1862_v8 }
 0x4a6   : > { %1954 = vst [vmem:[%s3109_s25 + $0x50] sm:$0xff] %v1927_v41 }
 0x4a9   : > { %v1864_v20 = vpop.f32.mrf.mxu1  ;;  %v1929_v22 = vpop.f32.mrf.mxu2 }
 0x4aa   : > { %v1865_v40 = vadd.f32 %v3100_v21, %v1864_v20 }
 0x4ac   : > { %v1930_v10 = vadd.f32 %v1929_v22, %v1865_v40 }
 0x4ae   : > { %1955 = vst [vmem:[%s3109_s25 + $0x58] sm:$0xff] %v1930_v10 }
 0x4b1   : > { %v1867_v11 = vpop.f32.mrf.mxu1  ;;  %v1932_v12 = vpop.f32.mrf.mxu2 }
 0x4b2   : > { %v1868_v13 = vadd.f32 %v3100_v21, %v1867_v11 }
 0x4b4   : > { %v1933_v14 = vadd.f32 %v1932_v12, %v1868_v13 }
 0x4b6   : > { %1956 = vst [vmem:[%s3109_s25 + $0x60] sm:$0xff] %v1933_v14 }
 0x4b9   : > { %v1870_v16 = vpop.f32.mrf.mxu1  ;;  %v1935_v18 = vpop.f32.mrf.mxu2 }
 0x4ba   : > { %v1871_v17 = vadd.f32 %v3100_v21, %v1870_v16 }
 0x4bc   : > { %v1936_v19 = vadd.f32 %v1935_v18, %v1871_v17 }
 0x4be   : > { %1957 = vst [vmem:[%s3109_s25 + $0x68] sm:$0xff] %v1936_v19 }
 0x4c7   : > { %v1873_v23 = vpop.f32.mrf.mxu3 }
 0x4c8   : > { %v1874_v24 = vadd.f32 %v3100_v21, %v1873_v23 }
 0x4cf   : > { %v1876_v28 = vpop.f32.mrf.mxu3 }
 0x4d0   : > { %v1877_v29 = vadd.f32 %v3100_v21, %v1876_v28 }
 0x4d7   : > { %v1938_v3 = vpop.f32.mrf.mxu2 }
 0x4d8   : > { %v1939_v27 = vadd.f32 %v1938_v3, %v1874_v24 }
 0x4da   : > { %1958 = vst [vmem:[%s3109_s25 + $0x70] sm:$0xff] %v1939_v27 }
 0x4df   : > { %v1941_v30 = vpop.f32.mrf.mxu2 }
 0x4e0   : > { %v1942_v54 = vadd.f32 %v1941_v30, %v1877_v29 }
 0x4e2   : > { %1959 = vst [vmem:[%s3109_s25 + $0x78] sm:$0xff] %v1942_v54 }
 0x4e3 PF: > { %s29_s18 = sadd.s32 1, %s2459_s18  }
 0x4e4   : > { %p26_p7 = scmp.ge.s32.totalorder %s29_s18, 4  }
 0x4e6   :  { %28 = sbr.rel (!%p26_p7) target bundleno = 8 (0x8), region = 135 }
 0x4eb   :  { %1982 = vsyncpa [#allocation3], 1 }
 0x4ec   :  { %1984 = vsyncpa [#allocation3 + $0x1], 1 }
 0x4ed   :  { %1985 = vsyncpa [#allocation5], 1 }
 0x4ee   :  { %1986 = vsyncpa [#allocation8], 1 }
 0x4ef   :  { %1987 = vsyncpa [#allocation11], 1 }

</bundles_post_ra>
